<compile_context>
chip_gen: v7x
topology: tpu7x:2x2x1
jax: 0.10.0
libtpu: 0.0.40
codegen_flags: <defaults>
</compile_context>

<pallas_src>
import functools

import numpy as np
import jax
import jax.numpy as jnp
from jax.experimental import pallas as pl
from jax.experimental.pallas import tpu as pltpu


# ----------------------------------------------------------------------------
# Wrapper-side (trace-time, numpy) constant construction
# ----------------------------------------------------------------------------
def _round8(n):
    return ((n + 7) // 8) * 8


def _pack_rows_np(blocks, width):
    """Stack 2-D blocks along rows at 8-aligned offsets inside one blob."""
    offs, total = [], 0
    for blk in blocks:
        offs.append(total)
        total += _round8(blk.shape[0])
    blob = np.zeros((total, width), np.float32)
    for off, blk in zip(offs, blocks):
        blob[off:off + blk.shape[0], :blk.shape[1]] = blk
    return blob, offs


def _conv_consts(w, bias, h_in, stride, pad, batch):
    """Lower one square Conv2d to (row-selection, folded-weight) matrices.

    Returns
      r    : (k*bhop, batch*h_in)      batch-block-diagonal row selectors,
                                       ki taps stacked along rows (bhop is the
                                       8-aligned per-ki row pitch).
      cw   : (k*cin*h_in, cout*h_out)  per-ki column matrices with the kj tap
                                       and the conv weights folded in.
      cb   : (cout*h_out,)             bias broadcast over output columns.
      meta : static layout info used by the kernel.
    """
    w = np.asarray(w, np.float32)
    bias = np.asarray(bias, np.float32)
    cout, cin, k, _ = w.shape
    h_out = (h_in + 2 * pad - k) // stride + 1
    bhop = _round8(batch * h_out)
    r = np.zeros((k * bhop, batch * h_in), np.float32)
    c = np.zeros((k, h_in, h_out), np.float32)
    for ki in range(k):
        for o in range(h_out):
            i = stride * o + ki - pad
            if 0 <= i < h_in:                      # zero padding baked in
                c[ki, i, o] = 1.0
                for b in range(batch):
                    r[ki * bhop + b * h_out + o, b * h_in + i] = 1.0
    # cw[ki, ci*h_in + win, co*h_out + wo] = sum_kj w[co,ci,ki,kj] * c[kj,win,wo]
    cw = np.einsum("ocij,jab->icaob", w, c).reshape(k * cin * h_in, cout * h_out)
    cb = np.repeat(bias, h_out)
    meta = dict(k=k, ho=h_out, bhop=bhop, bhin=batch * h_in,
                cwk=cin * h_in, cww=cout * h_out)
    return r, cw, cb, meta


# ----------------------------------------------------------------------------
# Parameter init (deterministic, mimics PyTorch default uniform(-1/sqrt(fan_in)))
# ----------------------------------------------------------------------------
def init_params(key, num_edge, num_pos, num_evader, num_action):
    def linear(k, fan_in, fan_out):
        k1, k2 = jax.random.split(k)
        bound = 1.0 / float(fan_in) ** 0.5
        w = jax.random.uniform(k1, (fan_in, fan_out), jnp.float32, -bound, bound)
        b = jax.random.uniform(k2, (fan_out,), jnp.float32, -bound, bound)
        return w, b

    def conv(k, cout, cin, kh, kw):
        k1, k2 = jax.random.split(k)
        fan_in = cin * kh * kw
        bound = 1.0 / float(fan_in) ** 0.5
        w = jax.random.uniform(k1, (cout, cin, kh, kw), jnp.float32, -bound, bound)
        b = jax.random.uniform(k2, (cout,), jnp.float32, -bound, bound)
        return w, b

    keys = jax.random.split(key, 7)
    in_n1 = num_pos + num_pos * num_evader + num_edge + 1
    return {
        "fc_n1": linear(keys[0], in_n1, 32),
        "conv1": conv(keys[1], 3, 1, 3, 3),
        "conv2": conv(keys[2], 3, 3, 4, 4),
        "conv3": conv(keys[3], 1, 3, 2, 2),
        "fc_link": linear(keys[4], 49, 24),
        "fc_hid1": linear(keys[5], 32 + 24, 48),
        "fc_action": linear(keys[6], 48, num_action),
    }


# ----------------------------------------------------------------------------
# Forward pass (mirrors DQN_net.forward) -- single fused pallas_call
# ----------------------------------------------------------------------------
def dqn_forward(params, steps, ego_pos, target_pos, traffic_state,
                topo_link_array, all_evaders_pos):
    # Weight packing below operates on concrete (non-traced) parameter arrays,
    # so under jax.jit(functools.partial(dqn_forward, params)) it is pure
    # trace-time constant construction with zero per-call runtime cost.
    del target_pos                       # unused in the reference forward too
    B = steps.shape[0]
    num_pos = ego_pos.shape[1]
    num_evader = all_evaders_pos.shape[1]
    n_ev = num_pos * num_evader
    n_edge = traffic_state.shape[1]
    E = topo_link_array.shape[-1]

    # --- activations: only free reshapes, no wrapper compute -----------------
    ev_flat = all_evaders_pos.reshape(B, n_ev)
    x0 = topo_link_array.reshape(B * E, E)          # rows=(b, row), cols=col

    # --- constant packing (numpy, trace-time) --------------------------------
    w1, b1 = (np.asarray(t, np.float32) for t in params["fc_n1"])
    wl, bl = (np.asarray(t, np.float32) for t in params["fc_link"])
    wh, bh = (np.asarray(t, np.float32) for t in params["fc_hid1"])
    wa, ba = (np.asarray(t, np.float32) for t in params["fc_action"])
    n_act = wa.shape[1]
    n_feat, n_link, n_hid = w1.shape[1], wl.shape[1], wh.shape[1]

    r1, cw1, cb1, m1 = _conv_consts(*params["conv1"], h_in=E, stride=2, pad=1, batch=B)
    r2, cw2, cb2, m2 = _conv_consts(*params["conv2"], h_in=m1["ho"], stride=3, pad=1, batch=B)
    r3, cw3, cb3, m3 = _conv_consts(*params["conv3"], h_in=m2["ho"], stride=1, pad=0, batch=B)
    metas = (m1, m2, m3)
    ho3, bhop3 = m3["ho"], m3["bhop"]
    assert ho3 * ho3 == wl.shape[0], "conv stack must yield a 7x7 map for fc_link(49, 24)"

    # fc_link weight laid out row-aligned with the conv3 output:
    #   wl2d[ow*bhop3 + b*ho3 + oh, j] = Wl[oh*7 + ow, j]   (pad rows = 0)
    wl2d = np.zeros((ho3 * bhop3, n_link), np.float32)
    for ow in range(ho3):
        for b in range(B):
            for oh in range(ho3):
                wl2d[ow * bhop3 + b * ho3 + oh, :] = wl[oh * ho3 + ow, :]

    # per-batch row-sum selector over the (padded) conv3/fc_link rows
    sel = np.zeros((B, bhop3), np.float32)
    for b in range(B):
        sel[b, b * ho3:(b + 1) * ho3] = 1.0

    # blob 1: FC weights (fc_n1 split at the torch.cat boundaries, fc_hid1
    #         split at the [feature | topo] boundary, fc_action).
    s1 = 1 + num_pos
    s2 = s1 + n_ev
    fc_blocks = [w1[:1], w1[1:s1], w1[s1:s2], w1[s2:], wh[:n_feat], wh[n_feat:], wa]
    fc_blob, fo = _pack_rows_np(fc_blocks, max(n_feat, n_hid, n_act))

    # blob 2: all biases (one row each) + the fc_link row-sum selector.
    sel_row = 8
    misc_w = max(n_feat, m1["cww"], m2["cww"], m3["cww"], n_link, n_hid, n_act, bhop3)
    misc = np.zeros((_round8(sel_row + B), misc_w), np.float32)
    misc[0, :n_feat] = b1
    misc[1, :m1["cww"]] = cb1
    misc[2, :m2["cww"]] = cb2
    misc[3, :m3["cww"]] = cb3
    misc[4, :n_link] = bl
    misc[5, :n_hid] = bh
    misc[6, :n_act] = ba
    misc[sel_row:sel_row + B, :bhop3] = sel

    # blob 3: conv row-selection matrices.  blob 4: conv weights + fc_link.
    r_blob, ro = _pack_rows_np([r1, r2, r3], max(m["bhin"] for m in metas))
    cwl_blob, co = _pack_rows_np([cw1, cw2, cw3, wl2d],
                                 max(m1["cww"], m2["cww"], m3["cww"], n_link))

    # --- the fused kernel -----------------------------------------------------
    def kernel(steps_ref, ego_ref, ev_ref, traffic_ref, x0_ref,
               wfc_ref, misc_ref, r_ref, cwl_ref, out_ref):
        f32 = jnp.float32

        def elu(v):
            # F.elu(alpha=1); min() keeps exp() off the discarded branch.
            return jnp.where(v > 0.0, v, jnp.exp(jnp.minimum(v, 0.0)) - 1.0)

        # ---- fc_n1: torch.cat folded into split-row matmuls (batched, M=B) --
        y = steps_ref[...] * wfc_ref[fo[0]:fo[0] + 1, :n_feat]
        y = y + jnp.dot(ego_ref[...], wfc_ref[fo[1]:fo[1] + num_pos, :n_feat],
                        preferred_element_type=f32)
        y = y + jnp.dot(ev_ref[...], wfc_ref[fo[2]:fo[2] + n_ev, :n_feat],
                        preferred_element_type=f32)
        y = y + jnp.dot(traffic_ref[...], wfc_ref[fo[3]:fo[3] + n_edge, :n_feat],
                        preferred_element_type=f32)
        feature = elu(y + misc_ref[0:1, :n_feat])                    # (B, 32)

        # ---- conv1..3 + ReLU; layout (B*H, C*W), batch/channels ride M/N/K --
        x = x0_ref[...]                                              # (B*E, E)
        for li, m in enumerate(metas):
            xin = x[:m["bhin"], :]
            a = jnp.dot(r_ref[ro[li]:ro[li] + m["k"] * m["bhop"], :m["bhin"]],
                        xin, preferred_element_type=f32)             # (k*bhop, cin*W)
            acc = misc_ref[1 + li:2 + li, :m["cww"]]                 # bias row
            for ki in range(m["k"]):
                a_ki = a[ki * m["bhop"]:(ki + 1) * m["bhop"], :]
                cw = cwl_ref[co[li] + ki * m["cwk"]:co[li] + (ki + 1) * m["cwk"],
                             :m["cww"]]
                acc = acc + jnp.dot(a_ki, cw, preferred_element_type=f32)
            x = jnp.maximum(acc, 0.0)                                # (bhop, cout*W')

        # ---- fc_link: contract ow on the VPU, then one matmul sums oh & b ---
        v = None
        for ow in range(ho3):
            wl_ow = cwl_ref[co[3] + ow * bhop3:co[3] + (ow + 1) * bhop3, :n_link]
            term = x[:, ow:ow + 1] * wl_ow                           # lane bcast
            v = term if v is None else v + term                      # (bhop3, 24)
        topo_feat = elu(jnp.dot(misc_ref[sel_row:sel_row + B, :bhop3], v,
                                preferred_element_type=f32)
                        + misc_ref[4:5, :n_link])                    # (B, 24)

        # ---- fc_hid1 + fc_action + softmax, batched over B ------------------
        hid = (jnp.dot(feature, wfc_ref[fo[4]:fo[4] + n_feat, :n_hid],
                       preferred_element_type=f32)
               + jnp.dot(topo_feat, wfc_ref[fo[5]:fo[5] + n_link, :n_hid],
                         preferred_element_type=f32)
               + misc_ref[5:6, :n_hid])
        hid = elu(hid)                                               # (B, 48)
        q = jnp.dot(hid, wfc_ref[fo[6]:fo[6] + n_hid, :n_act],
                    preferred_element_type=f32) + misc_ref[6:7, :n_act]
        q = q - jnp.max(q, axis=-1, keepdims=True)
        e = jnp.exp(q)
        out_ref[...] = (e / jnp.sum(e, axis=-1, keepdims=True)).astype(out_ref.dtype)

    args = (steps, ego_pos, ev_flat, traffic_state, x0,
            jnp.asarray(fc_blob), jnp.asarray(misc),
            jnp.asarray(r_blob), jnp.asarray(cwl_blob))
    vmem = pl.BlockSpec(memory_space=pltpu.MemorySpace.VMEM)
    return pl.pallas_call(
        kernel,
        out_shape=jax.ShapeDtypeStruct((B, n_act), jnp.float32),
        in_specs=[vmem] * len(args),
        out_specs=vmem,
    )(*args)


# ----------------------------------------------------------------------------
# Float64 numpy reference (for in-script correctness check)
# ----------------------------------------------------------------------------
def _ref_forward_np(params, steps, ego, traffic, topo, evaders):
    p = {k: tuple(np.asarray(t, np.float64) for t in v) for k, v in params.items()}

    def elu(x):
        return np.where(x > 0, x, np.expm1(np.minimum(x, 0)))

    def conv2d(x, w, b, s, pad):
        B, Cin, H, W = x.shape
        Cout, _, k, _ = w.shape
        xp = np.zeros((B, Cin, H + 2 * pad, W + 2 * pad))
        xp[:, :, pad:pad + H, pad:pad + W] = x
        Ho = (H + 2 * pad - k) // s + 1
        Wo = (W + 2 * pad - k) // s + 1
        out = np.zeros((B, Cout, Ho, Wo))
        for oh in range(Ho):
            for ow in range(Wo):
                patch = xp[:, :, s * oh:s * oh + k, s * ow:s * ow + k]
                out[:, :, oh, ow] = np.tensordot(patch, w, axes=([1, 2, 3], [1, 2, 3]))
        return out + b[None, :, None, None]

    steps, ego, traffic, topo, evaders = (
        np.asarray(a, np.float64) for a in (steps, ego, traffic, topo, evaders))
    B = steps.shape[0]
    all_in = np.concatenate(
        [steps, ego.reshape(B, -1), evaders.reshape(B, -1), traffic.reshape(B, -1)], 1)
    w1, b1 = p["fc_n1"]
    feat = elu(all_in @ w1 + b1)
    E = topo.shape[-1]
    x = topo.reshape(B, 1, E, E)
    x = np.maximum(conv2d(x, *p["conv1"], 2, 1), 0)
    x = np.maximum(conv2d(x, *p["conv2"], 3, 1), 0)
    x = np.maximum(conv2d(x, *p["conv3"], 1, 0), 0)
    wl, bl = p["fc_link"]
    tl = elu(x.reshape(B, -1) @ wl + bl)
    wh, bh = p["fc_hid1"]
    hid = elu(np.concatenate([feat, tl], 1) @ wh + bh)
    wa, ba = p["fc_action"]
    logits = hid @ wa + ba
    z = logits - logits.max(1, keepdims=True)
    ez = np.exp(z)
    return ez / ez.sum(1, keepdims=True)


if __name__ == "__main__":
    # num_edge = 48 so the conv stack yields the 7x7 (=49) feature map that
    # fc_link expects:  48 ->(k3,s2,p1) 24 ->(k4,s3,p1) 8 ->(k2,s1,p0) 7.
    num_edge, num_pos, num_evader, num_action = 48, 4, 2, 5
    B = 2

    key = jax.random.PRNGKey(0)
    kp, k0, k1, k2, k3, k4, k5 = jax.random.split(key, 7)
    params = init_params(kp, num_edge, num_pos, num_evader, num_action)

    steps = jax.random.uniform(k0, (B, 1), jnp.float32)
    ego_pos = jax.random.uniform(k1, (B, num_pos), jnp.float32)
    target_pos = jax.random.uniform(k2, (B, num_pos), jnp.float32)
    traffic_state = jax.random.uniform(k3, (B, num_edge), jnp.float32)
    topo_link_array = (
        jax.random.uniform(k4, (B, num_edge, num_edge)) > 0.5
    ).astype(jnp.float32)
    all_evaders_pos = jax.random.uniform(k5, (B, num_evader, num_pos), jnp.float32)

    fwd = jax.jit(functools.partial(dqn_forward, params))
    q = fwd(steps, ego_pos, target_pos, traffic_state, topo_link_array,
            all_evaders_pos)
    q = jax.block_until_ready(q)

    q_ref = _ref_forward_np(params, steps, ego_pos, traffic_state,
                            topo_link_array, all_evaders_pos)

    assert q.shape == (B, num_action)
    assert bool(jnp.all(jnp.isfinite(q)))
    assert bool(jnp.allclose(jnp.sum(q, axis=1), 1.0, atol=1e-5))
    assert float(np.max(np.abs(np.asarray(q, np.float64) - q_ref))) < 1e-2
    print("KERNEL_OK")
</pallas_src>

<mosaic_0001>
module attributes {stable_mosaic.version = 11 : i64} {
  func.func @kernel(%arg0: memref<2x1xf32, #tpu.memory_space<vmem>>, %arg1: memref<2x4xf32, #tpu.memory_space<vmem>>, %arg2: memref<2x8xf32, #tpu.memory_space<vmem>>, %arg3: memref<2x48xf32, #tpu.memory_space<vmem>>, %arg4: memref<96x48xf32, #tpu.memory_space<vmem>>, %arg5: memref<176x48xf32, #tpu.memory_space<vmem>>, %arg6: memref<16x72xf32, #tpu.memory_space<vmem>>, %arg7: memref<240x96xf32, #tpu.memory_space<vmem>>, %arg8: memref<592x72xf32, #tpu.memory_space<vmem>>, %arg9: memref<2x5xf32, #tpu.memory_space<vmem>>) attributes {dimension_semantics = [], scalar_prefetch = 0 : i64, scratch_operands = 0 : i64, tpu.core_type = #tpu.core_type<tc>} {
    %c0 = arith.constant 0 : index
    %c0_0 = arith.constant 0 : index
    %0 = vector.load %arg0[%c0, %c0_0] : memref<2x1xf32, #tpu.memory_space<vmem>>, vector<2x1xf32>
    %c0_1 = arith.constant 0 : index
    %c0_2 = arith.constant 0 : index
    %1 = vector.load %arg5[%c0_1, %c0_2] : memref<176x48xf32, #tpu.memory_space<vmem>>, vector<1x32xf32>
    %2 = vector.broadcast %0 : vector<2x1xf32> to vector<2x32xf32>
    %3 = vector.broadcast %1 : vector<1x32xf32> to vector<2x32xf32>
    %4 = arith.mulf %2, %3 : vector<2x32xf32>
    %c0_3 = arith.constant 0 : index
    %c0_4 = arith.constant 0 : index
    %5 = vector.load %arg1[%c0_3, %c0_4] : memref<2x4xf32, #tpu.memory_space<vmem>>, vector<2x4xf32>
    %c8 = arith.constant 8 : index
    %c0_5 = arith.constant 0 : index
    %6 = vector.load %arg5[%c8, %c0_5] : memref<176x48xf32, #tpu.memory_space<vmem>>, vector<4x32xf32>
    %cst = arith.constant dense<0.000000e+00> : vector<2x32xf32>
    %7 = tpu.matmul %5, %6, %cst {dimension_numbers = #tpu.dot_dimension_numbers<[1], [0], [0], [1], [0, 0, 1, 1], [], []>} : vector<2x4xf32>, vector<4x32xf32>, vector<2x32xf32> -> vector<2x32xf32>
    %8 = arith.addf %4, %7 : vector<2x32xf32>
    %c0_6 = arith.constant 0 : index
    %c0_7 = arith.constant 0 : index
    %9 = vector.load %arg2[%c0_6, %c0_7] : memref<2x8xf32, #tpu.memory_space<vmem>>, vector<2x8xf32>
    %c16 = arith.constant 16 : index
    %c0_8 = arith.constant 0 : index
    %10 = vector.load %arg5[%c16, %c0_8] : memref<176x48xf32, #tpu.memory_space<vmem>>, vector<8x32xf32>
    %cst_9 = arith.constant dense<0.000000e+00> : vector<2x32xf32>
    %11 = tpu.matmul %9, %10, %cst_9 {dimension_numbers = #tpu.dot_dimension_numbers<[1], [0], [0], [1], [0, 0, 1, 1], [], []>} : vector<2x8xf32>, vector<8x32xf32>, vector<2x32xf32> -> vector<2x32xf32>
    %12 = arith.addf %8, %11 : vector<2x32xf32>
    %c0_10 = arith.constant 0 : index
    %c0_11 = arith.constant 0 : index
    %13 = vector.load %arg3[%c0_10, %c0_11] : memref<2x48xf32, #tpu.memory_space<vmem>>, vector<2x48xf32>
    %c24 = arith.constant 24 : index
    %c0_12 = arith.constant 0 : index
    %14 = vector.load %arg5[%c24, %c0_12] : memref<176x48xf32, #tpu.memory_space<vmem>>, vector<48x32xf32>
    %cst_13 = arith.constant dense<0.000000e+00> : vector<2x32xf32>
    %15 = tpu.matmul %13, %14, %cst_13 {dimension_numbers = #tpu.dot_dimension_numbers<[1], [0], [0], [1], [0, 0, 1, 1], [], []>} : vector<2x48xf32>, vector<48x32xf32>, vector<2x32xf32> -> vector<2x32xf32>
    %16 = arith.addf %12, %15 : vector<2x32xf32>
    %c0_14 = arith.constant 0 : index
    %c0_15 = arith.constant 0 : index
    %17 = vector.load %arg6[%c0_14, %c0_15] : memref<16x72xf32, #tpu.memory_space<vmem>>, vector<1x32xf32>
    %18 = vector.broadcast %17 : vector<1x32xf32> to vector<2x32xf32>
    %19 = arith.addf %16, %18 : vector<2x32xf32>
    %cst_16 = arith.constant 0.000000e+00 : f32
    %20 = vector.broadcast %cst_16 : f32 to vector<2x32xf32>
    %21 = arith.cmpf ogt, %19, %20 : vector<2x32xf32>
    %cst_17 = arith.constant 0.000000e+00 : f32
    %22 = vector.broadcast %cst_17 : f32 to vector<2x32xf32>
    %23 = arith.minimumf %19, %22 : vector<2x32xf32>
    %24 = math.exp %23 : vector<2x32xf32>
    %cst_18 = arith.constant 1.000000e+00 : f32
    %25 = vector.broadcast %cst_18 : f32 to vector<2x32xf32>
    %26 = arith.subf %24, %25 : vector<2x32xf32>
    %27 = arith.select %21, %19, %26 : vector<2x32xi1>, vector<2x32xf32>
    %c0_19 = arith.constant 0 : index
    %c0_20 = arith.constant 0 : index
    %28 = vector.load %arg4[%c0_19, %c0_20] : memref<96x48xf32, #tpu.memory_space<vmem>>, vector<96x48xf32>
    %c0_21 = arith.constant 0 : index
    %c0_22 = arith.constant 0 : index
    %29 = vector.load %arg7[%c0_21, %c0_22] : memref<240x96xf32, #tpu.memory_space<vmem>>, vector<144x96xf32>
    %cst_23 = arith.constant dense<0.000000e+00> : vector<144x48xf32>
    %30 = tpu.matmul %29, %28, %cst_23 {dimension_numbers = #tpu.dot_dimension_numbers<[1], [0], [0], [1], [0, 0, 1, 1], [], []>} : vector<144x96xf32>, vector<96x48xf32>, vector<144x48xf32> -> vector<144x48xf32>
    %c1 = arith.constant 1 : index
    %c0_24 = arith.constant 0 : index
    %31 = vector.load %arg6[%c1, %c0_24] : memref<16x72xf32, #tpu.memory_space<vmem>>, vector<1x72xf32>
    %32 = vector.extract_strided_slice %30 {offsets = [0, 0], sizes = [48, 48], strides = [1, 1]} : vector<144x48xf32> to vector<48x48xf32>
    %c0_25 = arith.constant 0 : index
    %c0_26 = arith.constant 0 : index
    %33 = vector.load %arg8[%c0_25, %c0_26] : memref<592x72xf32, #tpu.memory_space<vmem>>, vector<48x72xf32>
    %cst_27 = arith.constant dense<0.000000e+00> : vector<48x72xf32>
    %34 = tpu.matmul %32, %33, %cst_27 {dimension_numbers = #tpu.dot_dimension_numbers<[1], [0], [0], [1], [0, 0, 1, 1], [], []>} : vector<48x48xf32>, vector<48x72xf32>, vector<48x72xf32> -> vector<48x72xf32>
    %35 = vector.broadcast %31 : vector<1x72xf32> to vector<48x72xf32>
    %36 = arith.addf %35, %34 : vector<48x72xf32>
    %37 = vector.extract_strided_slice %30 {offsets = [48, 0], sizes = [48, 48], strides = [1, 1]} : vector<144x48xf32> to vector<48x48xf32>
    %c48 = arith.constant 48 : index
    %c0_28 = arith.constant 0 : index
    %38 = vector.load %arg8[%c48, %c0_28] : memref<592x72xf32, #tpu.memory_space<vmem>>, vector<48x72xf32>
    %cst_29 = arith.constant dense<0.000000e+00> : vector<48x72xf32>
    %39 = tpu.matmul %37, %38, %cst_29 {dimension_numbers = #tpu.dot_dimension_numbers<[1], [0], [0], [1], [0, 0, 1, 1], [], []>} : vector<48x48xf32>, vector<48x72xf32>, vector<48x72xf32> -> vector<48x72xf32>
    %40 = arith.addf %36, %39 : vector<48x72xf32>
    %41 = vector.extract_strided_slice %30 {offsets = [96, 0], sizes = [48, 48], strides = [1, 1]} : vector<144x48xf32> to vector<48x48xf32>
    %c96 = arith.constant 96 : index
    %c0_30 = arith.constant 0 : index
    %42 = vector.load %arg8[%c96, %c0_30] : memref<592x72xf32, #tpu.memory_space<vmem>>, vector<48x72xf32>
    %cst_31 = arith.constant dense<0.000000e+00> : vector<48x72xf32>
    %43 = tpu.matmul %41, %42, %cst_31 {dimension_numbers = #tpu.dot_dimension_numbers<[1], [0], [0], [1], [0, 0, 1, 1], [], []>} : vector<48x48xf32>, vector<48x72xf32>, vector<48x72xf32> -> vector<48x72xf32>
    %44 = arith.addf %40, %43 : vector<48x72xf32>
    %cst_32 = arith.constant 0.000000e+00 : f32
    %45 = vector.broadcast %cst_32 : f32 to vector<48x72xf32>
    %46 = arith.maximumf %44, %45 : vector<48x72xf32>
    %c144 = arith.constant 144 : index
    %c0_33 = arith.constant 0 : index
    %47 = vector.load %arg7[%c144, %c0_33] : memref<240x96xf32, #tpu.memory_space<vmem>>, vector<64x48xf32>
    %cst_34 = arith.constant dense<0.000000e+00> : vector<64x72xf32>
    %48 = tpu.matmul %47, %46, %cst_34 {dimension_numbers = #tpu.dot_dimension_numbers<[1], [0], [0], [1], [0, 0, 1, 1], [], []>} : vector<64x48xf32>, vector<48x72xf32>, vector<64x72xf32> -> vector<64x72xf32>
    %c2 = arith.constant 2 : index
    %c0_35 = arith.constant 0 : index
    %49 = vector.load %arg6[%c2, %c0_35] : memref<16x72xf32, #tpu.memory_space<vmem>>, vector<1x24xf32>
    %50 = vector.extract_strided_slice %48 {offsets = [0, 0], sizes = [16, 72], strides = [1, 1]} : vector<64x72xf32> to vector<16x72xf32>
    %c144_36 = arith.constant 144 : index
    %c0_37 = arith.constant 0 : index
    %51 = vector.load %arg8[%c144_36, %c0_37] : memref<592x72xf32, #tpu.memory_space<vmem>>, vector<72x24xf32>
    %cst_38 = arith.constant dense<0.000000e+00> : vector<16x24xf32>
    %52 = tpu.matmul %50, %51, %cst_38 {dimension_numbers = #tpu.dot_dimension_numbers<[1], [0], [0], [1], [0, 0, 1, 1], [], []>} : vector<16x72xf32>, vector<72x24xf32>, vector<16x24xf32> -> vector<16x24xf32>
    %53 = vector.broadcast %49 : vector<1x24xf32> to vector<16x24xf32>
    %54 = arith.addf %53, %52 : vector<16x24xf32>
    %55 = vector.extract_strided_slice %48 {offsets = [16, 0], sizes = [16, 72], strides = [1, 1]} : vector<64x72xf32> to vector<16x72xf32>
    %c216 = arith.constant 216 : index
    %c0_39 = arith.constant 0 : index
    %56 = vector.load %arg8[%c216, %c0_39] : memref<592x72xf32, #tpu.memory_space<vmem>>, vector<72x24xf32>
    %cst_40 = arith.constant dense<0.000000e+00> : vector<16x24xf32>
    %57 = tpu.matmul %55, %56, %cst_40 {dimension_numbers = #tpu.dot_dimension_numbers<[1], [0], [0], [1], [0, 0, 1, 1], [], []>} : vector<16x72xf32>, vector<72x24xf32>, vector<16x24xf32> -> vector<16x24xf32>
    %58 = arith.addf %54, %57 : vector<16x24xf32>
    %59 = vector.extract_strided_slice %48 {offsets = [32, 0], sizes = [16, 72], strides = [1, 1]} : vector<64x72xf32> to vector<16x72xf32>
    %c288 = arith.constant 288 : index
    %c0_41 = arith.constant 0 : index
    %60 = vector.load %arg8[%c288, %c0_41] : memref<592x72xf32, #tpu.memory_space<vmem>>, vector<72x24xf32>
    %cst_42 = arith.constant dense<0.000000e+00> : vector<16x24xf32>
    %61 = tpu.matmul %59, %60, %cst_42 {dimension_numbers = #tpu.dot_dimension_numbers<[1], [0], [0], [1], [0, 0, 1, 1], [], []>} : vector<16x72xf32>, vector<72x24xf32>, vector<16x24xf32> -> vector<16x24xf32>
    %62 = arith.addf %58, %61 : vector<16x24xf32>
    %63 = vector.extract_strided_slice %48 {offsets = [48, 0], sizes = [16, 72], strides = [1, 1]} : vector<64x72xf32> to vector<16x72xf32>
    %c360 = arith.constant 360 : index
    %c0_43 = arith.constant 0 : index
    %64 = vector.load %arg8[%c360, %c0_43] : memref<592x72xf32, #tpu.memory_space<vmem>>, vector<72x24xf32>
    %cst_44 = arith.constant dense<0.000000e+00> : vector<16x24xf32>
    %65 = tpu.matmul %63, %64, %cst_44 {dimension_numbers = #tpu.dot_dimension_numbers<[1], [0], [0], [1], [0, 0, 1, 1], [], []>} : vector<16x72xf32>, vector<72x24xf32>, vector<16x24xf32> -> vector<16x24xf32>
    %66 = arith.addf %62, %65 : vector<16x24xf32>
    %cst_45 = arith.constant 0.000000e+00 : f32
    %67 = vector.broadcast %cst_45 : f32 to vector<16x24xf32>
    %68 = arith.maximumf %66, %67 : vector<16x24xf32>
    %c208 = arith.constant 208 : index
    %c0_46 = arith.constant 0 : index
    %69 = vector.load %arg7[%c208, %c0_46] : memref<240x96xf32, #tpu.memory_space<vmem>>, vector<32x16xf32>
    %cst_47 = arith.constant dense<0.000000e+00> : vector<32x24xf32>
    %70 = tpu.matmul %69, %68, %cst_47 {dimension_numbers = #tpu.dot_dimension_numbers<[1], [0], [0], [1], [0, 0, 1, 1], [], []>} : vector<32x16xf32>, vector<16x24xf32>, vector<32x24xf32> -> vector<32x24xf32>
    %c3 = arith.constant 3 : index
    %c0_48 = arith.constant 0 : index
    %71 = vector.load %arg6[%c3, %c0_48] : memref<16x72xf32, #tpu.memory_space<vmem>>, vector<1x7xf32>
    %72 = vector.extract_strided_slice %70 {offsets = [0, 0], sizes = [16, 24], strides = [1, 1]} : vector<32x24xf32> to vector<16x24xf32>
    %c432 = arith.constant 432 : index
    %c0_49 = arith.constant 0 : index
    %73 = vector.load %arg8[%c432, %c0_49] : memref<592x72xf32, #tpu.memory_space<vmem>>, vector<24x7xf32>
    %cst_50 = arith.constant dense<0.000000e+00> : vector<16x7xf32>
    %74 = tpu.matmul %72, %73, %cst_50 {dimension_numbers = #tpu.dot_dimension_numbers<[1], [0], [0], [1], [0, 0, 1, 1], [], []>} : vector<16x24xf32>, vector<24x7xf32>, vector<16x7xf32> -> vector<16x7xf32>
    %75 = vector.broadcast %71 : vector<1x7xf32> to vector<16x7xf32>
    %76 = arith.addf %75, %74 : vector<16x7xf32>
    %77 = vector.extract_strided_slice %70 {offsets = [16, 0], sizes = [16, 24], strides = [1, 1]} : vector<32x24xf32> to vector<16x24xf32>
    %c456 = arith.constant 456 : index
    %c0_51 = arith.constant 0 : index
    %78 = vector.load %arg8[%c456, %c0_51] : memref<592x72xf32, #tpu.memory_space<vmem>>, vector<24x7xf32>
    %cst_52 = arith.constant dense<0.000000e+00> : vector<16x7xf32>
    %79 = tpu.matmul %77, %78, %cst_52 {dimension_numbers = #tpu.dot_dimension_numbers<[1], [0], [0], [1], [0, 0, 1, 1], [], []>} : vector<16x24xf32>, vector<24x7xf32>, vector<16x7xf32> -> vector<16x7xf32>
    %80 = arith.addf %76, %79 : vector<16x7xf32>
    %cst_53 = arith.constant 0.000000e+00 : f32
    %81 = vector.broadcast %cst_53 : f32 to vector<16x7xf32>
    %82 = arith.maximumf %80, %81 : vector<16x7xf32>
    %c480 = arith.constant 480 : index
    %c0_54 = arith.constant 0 : index
    %83 = vector.load %arg8[%c480, %c0_54] : memref<592x72xf32, #tpu.memory_space<vmem>>, vector<16x24xf32>
    %84 = vector.extract_strided_slice %82 {offsets = [0, 0], sizes = [16, 1], strides = [1, 1]} : vector<16x7xf32> to vector<16x1xf32>
    %85 = vector.broadcast %84 : vector<16x1xf32> to vector<16x24xf32>
    %86 = arith.mulf %85, %83 : vector<16x24xf32>
    %c496 = arith.constant 496 : index
    %c0_55 = arith.constant 0 : index
    %87 = vector.load %arg8[%c496, %c0_55] : memref<592x72xf32, #tpu.memory_space<vmem>>, vector<16x24xf32>
    %88 = vector.extract_strided_slice %82 {offsets = [0, 1], sizes = [16, 1], strides = [1, 1]} : vector<16x7xf32> to vector<16x1xf32>
    %89 = vector.broadcast %88 : vector<16x1xf32> to vector<16x24xf32>
    %90 = arith.mulf %89, %87 : vector<16x24xf32>
    %91 = arith.addf %86, %90 : vector<16x24xf32>
    %c512 = arith.constant 512 : index
    %c0_56 = arith.constant 0 : index
    %92 = vector.load %arg8[%c512, %c0_56] : memref<592x72xf32, #tpu.memory_space<vmem>>, vector<16x24xf32>
    %93 = vector.extract_strided_slice %82 {offsets = [0, 2], sizes = [16, 1], strides = [1, 1]} : vector<16x7xf32> to vector<16x1xf32>
    %94 = vector.broadcast %93 : vector<16x1xf32> to vector<16x24xf32>
    %95 = arith.mulf %94, %92 : vector<16x24xf32>
    %96 = arith.addf %91, %95 : vector<16x24xf32>
    %c528 = arith.constant 528 : index
    %c0_57 = arith.constant 0 : index
    %97 = vector.load %arg8[%c528, %c0_57] : memref<592x72xf32, #tpu.memory_space<vmem>>, vector<16x24xf32>
    %98 = vector.extract_strided_slice %82 {offsets = [0, 3], sizes = [16, 1], strides = [1, 1]} : vector<16x7xf32> to vector<16x1xf32>
    %99 = vector.broadcast %98 : vector<16x1xf32> to vector<16x24xf32>
    %100 = arith.mulf %99, %97 : vector<16x24xf32>
    %101 = arith.addf %96, %100 : vector<16x24xf32>
    %c544 = arith.constant 544 : index
    %c0_58 = arith.constant 0 : index
    %102 = vector.load %arg8[%c544, %c0_58] : memref<592x72xf32, #tpu.memory_space<vmem>>, vector<16x24xf32>
    %103 = vector.extract_strided_slice %82 {offsets = [0, 4], sizes = [16, 1], strides = [1, 1]} : vector<16x7xf32> to vector<16x1xf32>
    %104 = vector.broadcast %103 : vector<16x1xf32> to vector<16x24xf32>
    %105 = arith.mulf %104, %102 : vector<16x24xf32>
    %106 = arith.addf %101, %105 : vector<16x24xf32>
    %c560 = arith.constant 560 : index
    %c0_59 = arith.constant 0 : index
    %107 = vector.load %arg8[%c560, %c0_59] : memref<592x72xf32, #tpu.memory_space<vmem>>, vector<16x24xf32>
    %108 = vector.extract_strided_slice %82 {offsets = [0, 5], sizes = [16, 1], strides = [1, 1]} : vector<16x7xf32> to vector<16x1xf32>
    %109 = vector.broadcast %108 : vector<16x1xf32> to vector<16x24xf32>
    %110 = arith.mulf %109, %107 : vector<16x24xf32>
    %111 = arith.addf %106, %110 : vector<16x24xf32>
    %c576 = arith.constant 576 : index
    %c0_60 = arith.constant 0 : index
    %112 = vector.load %arg8[%c576, %c0_60] : memref<592x72xf32, #tpu.memory_space<vmem>>, vector<16x24xf32>
    %113 = vector.extract_strided_slice %82 {offsets = [0, 6], sizes = [16, 1], strides = [1, 1]} : vector<16x7xf32> to vector<16x1xf32>
    %114 = vector.broadcast %113 : vector<16x1xf32> to vector<16x24xf32>
    %115 = arith.mulf %114, %112 : vector<16x24xf32>
    %116 = arith.addf %111, %115 : vector<16x24xf32>
    %c8_61 = arith.constant 8 : index
    %c0_62 = arith.constant 0 : index
    %117 = vector.load %arg6[%c8_61, %c0_62] : memref<16x72xf32, #tpu.memory_space<vmem>>, vector<2x16xf32>
    %cst_63 = arith.constant dense<0.000000e+00> : vector<2x24xf32>
    %118 = tpu.matmul %117, %116, %cst_63 {dimension_numbers = #tpu.dot_dimension_numbers<[1], [0], [0], [1], [0, 0, 1, 1], [], []>} : vector<2x16xf32>, vector<16x24xf32>, vector<2x24xf32> -> vector<2x24xf32>
    %c4 = arith.constant 4 : index
    %c0_64 = arith.constant 0 : index
    %119 = vector.load %arg6[%c4, %c0_64] : memref<16x72xf32, #tpu.memory_space<vmem>>, vector<1x24xf32>
    %120 = vector.broadcast %119 : vector<1x24xf32> to vector<2x24xf32>
    %121 = arith.addf %118, %120 : vector<2x24xf32>
    %cst_65 = arith.constant 0.000000e+00 : f32
    %122 = vector.broadcast %cst_65 : f32 to vector<2x24xf32>
    %123 = arith.cmpf ogt, %121, %122 : vector<2x24xf32>
    %cst_66 = arith.constant 0.000000e+00 : f32
    %124 = vector.broadcast %cst_66 : f32 to vector<2x24xf32>
    %125 = arith.minimumf %121, %124 : vector<2x24xf32>
    %126 = math.exp %125 : vector<2x24xf32>
    %cst_67 = arith.constant 1.000000e+00 : f32
    %127 = vector.broadcast %cst_67 : f32 to vector<2x24xf32>
    %128 = arith.subf %126, %127 : vector<2x24xf32>
    %129 = arith.select %123, %121, %128 : vector<2x24xi1>, vector<2x24xf32>
    %c72 = arith.constant 72 : index
    %c0_68 = arith.constant 0 : index
    %130 = vector.load %arg5[%c72, %c0_68] : memref<176x48xf32, #tpu.memory_space<vmem>>, vector<32x48xf32>
    %cst_69 = arith.constant dense<0.000000e+00> : vector<2x48xf32>
    %131 = tpu.matmul %27, %130, %cst_69 {dimension_numbers = #tpu.dot_dimension_numbers<[1], [0], [0], [1], [0, 0, 1, 1], [], []>} : vector<2x32xf32>, vector<32x48xf32>, vector<2x48xf32> -> vector<2x48xf32>
    %c104 = arith.constant 104 : index
    %c0_70 = arith.constant 0 : index
    %132 = vector.load %arg5[%c104, %c0_70] : memref<176x48xf32, #tpu.memory_space<vmem>>, vector<24x48xf32>
    %cst_71 = arith.constant dense<0.000000e+00> : vector<2x48xf32>
    %133 = tpu.matmul %129, %132, %cst_71 {dimension_numbers = #tpu.dot_dimension_numbers<[1], [0], [0], [1], [0, 0, 1, 1], [], []>} : vector<2x24xf32>, vector<24x48xf32>, vector<2x48xf32> -> vector<2x48xf32>
    %134 = arith.addf %131, %133 : vector<2x48xf32>
    %c5 = arith.constant 5 : index
    %c0_72 = arith.constant 0 : index
    %135 = vector.load %arg6[%c5, %c0_72] : memref<16x72xf32, #tpu.memory_space<vmem>>, vector<1x48xf32>
    %136 = vector.broadcast %135 : vector<1x48xf32> to vector<2x48xf32>
    %137 = arith.addf %134, %136 : vector<2x48xf32>
    %cst_73 = arith.constant 0.000000e+00 : f32
    %138 = vector.broadcast %cst_73 : f32 to vector<2x48xf32>
    %139 = arith.cmpf ogt, %137, %138 : vector<2x48xf32>
    %cst_74 = arith.constant 0.000000e+00 : f32
    %140 = vector.broadcast %cst_74 : f32 to vector<2x48xf32>
    %141 = arith.minimumf %137, %140 : vector<2x48xf32>
    %142 = math.exp %141 : vector<2x48xf32>
    %cst_75 = arith.constant 1.000000e+00 : f32
    %143 = vector.broadcast %cst_75 : f32 to vector<2x48xf32>
    %144 = arith.subf %142, %143 : vector<2x48xf32>
    %145 = arith.select %139, %137, %144 : vector<2x48xi1>, vector<2x48xf32>
    %c128 = arith.constant 128 : index
    %c0_76 = arith.constant 0 : index
    %146 = vector.load %arg5[%c128, %c0_76] : memref<176x48xf32, #tpu.memory_space<vmem>>, vector<48x5xf32>
    %cst_77 = arith.constant dense<0.000000e+00> : vector<2x5xf32>
    %147 = tpu.matmul %145, %146, %cst_77 {dimension_numbers = #tpu.dot_dimension_numbers<[1], [0], [0], [1], [0, 0, 1, 1], [], []>} : vector<2x48xf32>, vector<48x5xf32>, vector<2x5xf32> -> vector<2x5xf32>
    %c6 = arith.constant 6 : index
    %c0_78 = arith.constant 0 : index
    %148 = vector.load %arg6[%c6, %c0_78] : memref<16x72xf32, #tpu.memory_space<vmem>>, vector<1x5xf32>
    %149 = vector.broadcast %148 : vector<1x5xf32> to vector<2x5xf32>
    %150 = arith.addf %147, %149 : vector<2x5xf32>
    %cst_79 = arith.constant dense<0xFF800000> : vector<2xf32>
    %151 = vector.multi_reduction <maximumf>, %150, %cst_79 [1] : vector<2x5xf32> to vector<2xf32>
    %152 = vector.shape_cast %151 : vector<2xf32> to vector<2x1xf32>
    %153 = vector.broadcast %152 : vector<2x1xf32> to vector<2x5xf32>
    %154 = arith.subf %150, %153 : vector<2x5xf32>
    %155 = math.exp %154 : vector<2x5xf32>
    %cst_80 = arith.constant dense<0.000000e+00> : vector<2xf32>
    %156 = vector.multi_reduction <add>, %155, %cst_80 [1] : vector<2x5xf32> to vector<2xf32>
    %157 = vector.shape_cast %156 : vector<2xf32> to vector<2x1xf32>
    %158 = vector.broadcast %157 : vector<2x1xf32> to vector<2x5xf32>
    %159 = arith.divf %155, %158 : vector<2x5xf32>
    %c0_81 = arith.constant 0 : index
    %c0_82 = arith.constant 0 : index
    %160 = vector.load %arg9[%c0_81, %c0_82] : memref<2x5xf32, #tpu.memory_space<vmem>>, vector<2x5xf32>
    tpu.vector_store %arg9[%c0_81, %c0_82], %159 {strides = array<i32>} : memref<2x5xf32, #tpu.memory_space<vmem>>, vector<2x5xf32>,
    return
  }
}

</mosaic_0001>

<bundles_post_ra>
// kernel: dqn_forward.1
= control target key start
LH: loop header
LB: loop body
LE: loop exit
PB: predicated region body
PF: predicated region fallthrough
CT: control target
= control target key end

     0   :  { %14 = vsyncpa [#allocation3], 0  ;;  %s3462_s0 = inlined_call_operand.vmem [shape: f32[2,1], index: 0, kind: input, shape index: {}]   ;;  %s3463_s1 = inlined_call_operand.vmem [shape: f32[2,4], index: 1, kind: input, shape index: {}]   ;;  %s3464_s2 = inlined_call_operand.vmem [shape: f32[2,8], index: 2, kind: input, shape index: {}]   ;;  %s3465_s3 = inlined_call_operand.vmem [shape: f32[2,48], index: 3, kind: input, shape index: {}]   ;;  %s3466_s4 = inlined_call_operand.hbm [shape: f32[96,48], index: 4, kind: input, shape index: {}]   ;;  %s3467_s5 = inlined_call_operand.hbm [shape: f32[176,48], index: 5, kind: input, shape index: {}]   ;;  %s3468_s6 = inlined_call_operand.vmem [shape: f32[16,72], index: 6, kind: input, shape index: {}]   ;;  %s3469_s7 = inlined_call_operand.hbm [shape: f32[240,96], index: 7, kind: input, shape index: {}]   ;;  %s3470_s8 = inlined_call_operand.hbm [shape: f32[592,72], index: 8, kind: input, shape index: {}]   ;;  %s3471_s9 = inlined_call_operand.hbm [shape: f32[2,5], index: 9, kind: output, shape index: {}]  }
   0x1   :  { %15 = vsyncpa [#allocation6], 0 }
   0x2   :  { %16 = vsyncpa [#allocation9], 0 }
   0x3   :  { %17 = vsyncpa [#allocation4], 0  ;;  %s3170_s30 = smov [#allocation5]   ;;  %s3171_s11 = smov [#allocation2]  }
   0x4   :  { %s43_s10 = sshll.u32 %s3170_s30, 4  ;;  %s31_s12 = sshll.u32 %s3171_s11, 4  ;;  %s44_s10 = int_to_ptr.vmem [resolvable:$true] %s43_s10  ;;  %s3237_s12 = int_to_ptr.vmem [resolvable:$true] %s31_s12 }
   0x5   :  { %s3052_s15 = scalar_lea.hbm %s3467_s5, 2816 }
   0x6   :  { %p3053_p0 = scmp.ne.s32.totalorder %s3467_s5, %s3052_s15  ;;  %p3056_p1 = scmp.lt.u32.totalorder %s3052_s15, %s3467_s5 }
   0x8   :  { %p3058_p2 = pnand %p3056_p1, %p3053_p0 }
   0xa   :  { %3061 = shalt.err (!%p3058_p2)
}
   0xb   :  { %s3062_s20 = scalar_lea.vmem %s44_s10, 2816  ;;  %p3067_p4 = scmp.lt.s32.totalorder %s44_s10, %s44_s10 }
   0xc   :  { %p3063_p3 = scmp.ne.s32.totalorder %s44_s10, %s3062_s20  ;;  %p3068_p5 = scmp.lt.s32.totalorder %s3062_s20, %s3062_s20 }
   0xe   :  { %p3069_p6 = por %p3068_p5, %p3067_p4 }
  0x10   :  { %p3070_p7 = pnand %p3069_p6, %p3063_p3 }
  0x12   :  { %3073 = shalt.err (!%p3070_p7)
}
  0x13   :  { %s3172_s21 = smov 128   ;;  %s3173_s22 = smov 8  }
  0x14   :  { %49 = dma.hbm_to_vmem [thread:$0]  %s3467_s5, 2816, %s44_s10, [#allocation6], %s3172_s21, %s3172_s21, %s3173_s22  }
  0x15   :  { %s3074_s27 = scalar_lea.hbm %s3466_s4, 1536 }
  0x16   :  { %p3075_p8 = scmp.ne.s32.totalorder %s3466_s4, %s3074_s27  ;;  %p3078_p9 = scmp.lt.u32.totalorder %s3074_s27, %s3466_s4 }
  0x18   :  { %p3080_p10 = pnand %p3078_p9, %p3075_p8 }
  0x1a   :  { %3083 = shalt.err (!%p3080_p10)
}
  0x1b   :  { %s3084_s13 = scalar_lea.vmem %s3237_s12, 1536  ;;  %p3089_p12 = scmp.lt.s32.totalorder %s3237_s12, %s3237_s12 }
  0x1c   :  { %p3085_p11 = scmp.ne.s32.totalorder %s3237_s12, %s3084_s13  ;;  %p3090_p13 = scmp.lt.s32.totalorder %s3084_s13, %s3084_s13 }
  0x1e   :  { %p3091_p0 = por %p3090_p13, %p3089_p12 }
  0x20   :  { %p3092_p1 = pnand %p3091_p0, %p3085_p11 }
  0x22   :  { %3095 = shalt.err (!%p3092_p1)
}
  0x23   :  { %37 = dma.hbm_to_vmem [thread:$0]  %s3466_s4, 1536, %s3237_s12, [#allocation3], %s3172_s21, %s3172_s21, %s3173_s22  }
  0x24   :  { %s3174_s14 = smov [#allocation7]   ;;  %s3175_s16 = smov [#allocation8]  }
  0x25   :  { %s57_s15 = sshll.u32 %s3174_s14, 4  ;;  %s69_s17 = sshll.u32 %s3175_s16, 4  ;;  %s58_s15 = int_to_ptr.vmem [resolvable:$true] %s57_s15  ;;  %s3274_s17 = int_to_ptr.vmem [resolvable:$true] %s69_s17 }
  0x26   :  { %s3096_s20 = scalar_lea.hbm %s3469_s7, 3840 }
  0x27   :  { %p3097_p2 = scmp.ne.s32.totalorder %s3469_s7, %s3096_s20  ;;  %p3100_p3 = scmp.lt.u32.totalorder %s3096_s20, %s3469_s7 }
  0x29   :  { %p3102_p4 = pnand %p3100_p3, %p3097_p2 }
  0x2b   :  { %3105 = shalt.err (!%p3102_p4)
}
  0x2c   :  { %s3106_s4 = scalar_lea.vmem %s58_s15, 3840  ;;  %p3111_p6 = scmp.lt.s32.totalorder %s58_s15, %s58_s15 }
  0x2d   :  { %p3107_p5 = scmp.ne.s32.totalorder %s58_s15, %s3106_s4  ;;  %p3112_p7 = scmp.lt.s32.totalorder %s3106_s4, %s3106_s4 }
  0x2f   :  { %p3113_p8 = por %p3112_p7, %p3111_p6 }
  0x31   :  { %p3114_p9 = pnand %p3113_p8, %p3107_p5 }
  0x33   :  { %3117 = shalt.err (!%p3114_p9)
}
  0x34   :  { %63 = dma.hbm_to_vmem [thread:$0]  %s3469_s7, 3840, %s58_s15, [#allocation6], %s3172_s21, %s3172_s21, %s3173_s22  }
  0x35   :  { %s3118_s30 = scalar_lea.hbm %s3470_s8, 9472 }
  0x36   :  { %p3119_p10 = scmp.ne.s32.totalorder %s3470_s8, %s3118_s30  ;;  %p3122_p11 = scmp.lt.u32.totalorder %s3118_s30, %s3470_s8 }
  0x38   :  { %p3124_p12 = pnand %p3122_p11, %p3119_p10 }
  0x3a   :  { %3127 = shalt.err (!%p3124_p12)
}
  0x3b   :  { %s3128_s14 = scalar_lea.vmem %s3274_s17, 9472  ;;  %p3133_p0 = scmp.lt.s32.totalorder %s3274_s17, %s3274_s17 }
  0x3c   :  { %p3129_p13 = scmp.ne.s32.totalorder %s3274_s17, %s3128_s14  ;;  %p3134_p1 = scmp.lt.s32.totalorder %s3128_s14, %s3128_s14 }
  0x3e   :  { %p3135_p2 = por %p3134_p1, %p3133_p0 }
  0x40   :  { %p3136_p3 = pnand %p3135_p2, %p3129_p13 }
  0x42   :  { %3139 = shalt.err (!%p3136_p3)
}
  0x43   :  { %75 = dma.hbm_to_vmem [thread:$0]  %s3470_s8, 9472, %s3274_s17, [#allocation9], %s3172_s21, %s3172_s21, %s3173_s22  }
  0x44   :  { %3162 = dma.done.wait [#allocation3], 1536  }
  0x45   :  { %3163 = vsyncadd [#allocation3], 4294965760 }
  0x46   :  { %3164 = dma.done.wait [#allocation6], 6656  }
  0x47   :  { %3165 = vsyncadd [#allocation6], 4294960640 }
  0x48   :  { %3166 = dma.done.wait [#allocation9], 9472  }
  0x49   :  { %3167 = vsyncadd [#allocation9], 4294957824  ;;  %v3176_v0 = vmov 0.0   ;;  %vm3177_vm0 = vmmov 0   ;;  %vm106_vm1 = vcmask 1043456   ;;  %vm102_vm2 = vcmask 31744  }
  0x4a   :  { %2485 = vmatprep.subr.mxu1 %v3176_v0  ;;  %2487 = vmatprep.mubr.msk.f32.mxu1 %vm3177_vm0, %v3176_v0  ;;  %v101_v1 = vld [vmem:[#allocation5 + $0x8] sm:$0xf]  ;;  %v100_v2 = vld [vmem:[%s3463_s1] sm:$0x3]  ;;  %v182_v3 = vld [vmem:[#allocation5 + $0x10] sm:$0xff]  ;;  %vm183_vm3 = vcmask 64512  }
  0x4b   :  { %2507 = vmatprep.mubr.msk.f32.mxu0 %vm3177_vm0, %v3176_v0  ;;  %2486 = vmatpush3.msk.msra.mxu1 %vm106_vm1, %v101_v1  ;;  %v352_v4 = vld [vmem:[#allocation2] sm:$0xff]  ;;  %v353_v5 = vld [vmem:[#allocation2 + $0x8] sm:$0xff]  ;;  %v354_v7 = vld [vmem:[#allocation2 + $0x10] sm:$0xff]  ;;  %vm382_vm4 = vcmask 785408   ;;  %v3178_v44 = vmov 0.0|0.0   ;;  %vm265_vm5 = vcmask 392192  }
  0x4c   :  { %2488 = vmatmul.mubr.msk.f32.vlgmr.msra.gmra.mrb[0].mxu1 %vm102_vm2, %v100_v2  ;;  %2490 = vmatprep.subr.mxu1 %v3176_v0  ;;  %v2811_v6 = vpack.c.bf16 %v353_v5, %v352_v4  ;;  %v355_v8 = vld [vmem:[#allocation2 + $0x18] sm:$0xff]  ;;  %v181_v9 = vld [vmem:[%s3464_s2] sm:$0x3]  ;;  %v357_v12 = vld [vmem:[#allocation2 + $0x28] sm:$0xff]  ;;  %vm1125_vm6 = vcmask 588800   ;;  %vm1495_vm7 = vcmask 130048  }
  0x4d   :  { %2491 = vmatpush3.msra.mxu1 %v182_v3  ;;  %2492 = vmatprep.mubr.msk.f32.mxu1 %vm3177_vm0, %v3176_v0  ;;  %v2815_v10 = vpack.c.bf16 %v355_v8, %v354_v7  ;;  %v356_v11 = vld [vmem:[#allocation2 + $0x20] sm:$0xff]  ;;  %v364_v13 = vld [vmem:[#allocation7] sm:$0xff]  ;;  %v359_v16 = vld [vmem:[#allocation2 + $0x38] sm:$0xff]  ;;  %vm1597_vm8 = vcmask 195584   ;;  %vm2036_vm10 = vcmask 261120   ;;  %vm2206_vm13 = vcmask 33792  }
  0x4e   :  { %2812 = vmatprep.subr.bf16.mxu1 %v2811_v6  ;;  %v2819_v14 = vpack.c.bf16 %v357_v12, %v356_v11  ;;  %v358_v15 = vld [vmem:[#allocation2 + $0x30] sm:$0xff]  ;;  %v360_v18 = vld [vmem:[#allocation2 + $0x40] sm:$0xff]  ;;  %v361_v19 = vld [vmem:[#allocation2 + $0x48] sm:$0xff]  ;;  %2802 = vmatprep.subr.bf16.mxu0 %v3178_v44  ;;  %s3186_s5 = smov [#allocation10]  }
  0x4f   :  { %v2823_v17 = vpack.c.bf16 %v359_v16, %v358_v15  ;;  %v2827_v20 = vpack.c.bf16 %v361_v19, %v360_v18  ;;  %v362_v21 = vld [vmem:[#allocation2 + $0x50] sm:$0xff]  ;;  %v363_v22 = vld [vmem:[#allocation2 + $0x58] sm:$0xff]  ;;  %v366_v25 = vld [vmem:[#allocation7 + $0x10] sm:$0xff]  ;;  %s2225_s10 = sshll.u32 %s3186_s5, 4  ;;  %s2226_s10 = int_to_ptr.vmem [resolvable:$true] %s2225_s10 }
  0x50   :  { %2493 = vmatmul.mubr.msk.f32.vlgmr.msra.gmra.mrb[2].mxu1 %vm183_vm3, %v181_v9  ;;  %v2831_v23 = vpack.c.bf16 %v363_v22, %v362_v21  ;;  %v365_v24 = vld [vmem:[#allocation7 + $0x8] sm:$0xff]  ;;  %v367_v26 = vld [vmem:[#allocation7 + $0x18] sm:$0xff]  ;;  %v368_v27 = vld [vmem:[#allocation7 + $0x20] sm:$0xff]  ;;  %p3145_p5 = scmp.lt.s32.totalorder %s2226_s10, %s2226_s10 }
  0x51   :  { %2814 = vmatpush3.bf16.msra.mxu1 %v2811_v6  ;;  %2534 = vmatprep.mubr.msk.f32.mxu1 %vm382_vm4, %v364_v13  ;;  %v369_v28 = vld [vmem:[#allocation7 + $0x28] sm:$0xff]  ;;  %v370_v29 = vld [vmem:[#allocation7 + $0x30] sm:$0xff]  ;;  %v371_v30 = vld [vmem:[#allocation7 + $0x38] sm:$0xff] }
  0x52   :  { %2816 = vmatprep.subr.bf16.mxu1 %v2815_v10  ;;  %v372_v31 = vld [vmem:[#allocation7 + $0x40] sm:$0xff]  ;;  %v373_v32 = vld [vmem:[#allocation7 + $0x48] sm:$0xff]  ;;  %v374_v33 = vld [vmem:[#allocation7 + $0x50] sm:$0xff] }
  0x53   :  { %v375_v34 = vld [vmem:[#allocation7 + $0x58] sm:$0xff]  ;;  %v376_v35 = vld [vmem:[#allocation7 + $0x60] sm:$0xff]  ;;  %v377_v36 = vld [vmem:[#allocation7 + $0x68] sm:$0xff] }
  0x54   :  { %v378_v37 = vld [vmem:[#allocation7 + $0x70] sm:$0xff]  ;;  %v379_v38 = vld [vmem:[#allocation7 + $0x78] sm:$0xff]  ;;  %v380_v39 = vld [vmem:[#allocation7 + $0x80] sm:$0xff] }
  0x55   :  { %2818 = vmatpush3.bf16.msra.mxu1 %v2815_v10  ;;  %v381_v40 = vld [vmem:[#allocation7 + $0x88] sm:$0xff]  ;;  %v260_v42 = vld [vmem:[#allocation5 + $0x20] sm:$0xff]  ;;  %v261_v43 = vld [vmem:[#allocation5 + $0x28] sm:$0xff] }
  0x56   :  { %2820 = vmatprep.subr.bf16.mxu1 %v2819_v14  ;;  %v259_v41 = vld [vmem:[#allocation5 + $0x18] sm:$0xff]  ;;  %v262_v46 = vld [vmem:[#allocation5 + $0x30] sm:$0xff]  ;;  %v264_v49 = vld [vmem:[#allocation5 + $0x40] sm:$0xff] }
  0x57   :  { %v2803_v45 = vpack.c.bf16 %v260_v42, %v259_v41  ;;  %v2806_v47 = vpack.c.bf16 %v262_v46, %v261_v43  ;;  %v263_v48 = vld [vmem:[#allocation5 + $0x38] sm:$0xff]  ;;  %v593_v50 = vld [vmem:[#allocation8] sm:$0xff]  ;;  %v594_v51 = vld [vmem:[#allocation8 + $0x8] sm:$0xff] }
  0x58   :  { %v2809_v52 = vpack.c.bf16 %v264_v49, %v263_v48  ;;  %v2835_v53 = vpack.c.bf16 %v594_v51, %v593_v50  ;;  %v595_v54 = vld [vmem:[#allocation8 + $0x10] sm:$0xff]  ;;  %v596_v55 = vld [vmem:[#allocation8 + $0x18] sm:$0xff]  ;;  %v258_v56 = vld [vmem:[%s3465_s3] sm:$0x3] }
  0x59   :  { %2822 = vmatpush3.bf16.msra.mxu1 %v2819_v14  ;;  %2804 = vmatpush3.bf16.msra.mxu0 %v2803_v45  ;;  %v2839_v57 = vpack.c.bf16 %v596_v55, %v595_v54  ;;  %v597_v58 = vld [vmem:[#allocation8 + $0x20] sm:$0xff]  ;;  %v598_v59 = vld [vmem:[#allocation8 + $0x28] sm:$0xff]  ;;  %v722_v61 = vld [vmem:[#allocation8 + $0x30] sm:$0xff] }
  0x5a   :  { %2824 = vmatprep.subr.bf16.mxu1 %v2823_v17  ;;  %2805 = vmatprep.subr.bf16.mxu0 %v3178_v44  ;;  %v2843_v60 = vpack.c.bf16 %v598_v59, %v597_v58  ;;  %v723_v62 = vld [vmem:[#allocation8 + $0x38] sm:$0xff]  ;;  %v724_v5 = vld [vmem:[#allocation8 + $0x40] sm:$0xff]  ;;  %v725_v6 = vld [vmem:[#allocation8 + $0x48] sm:$0xff] }
  0x5b   :  { %v2847_v63 = vpack.c.bf16 %v723_v62, %v722_v61  ;;  %v2851_v9 = vpack.c.bf16 %v725_v6, %v724_v5  ;;  %v726_v10 = vld [vmem:[#allocation8 + $0x50] sm:$0xff]  ;;  %v727_v11 = vld [vmem:[#allocation8 + $0x58] sm:$0xff]  ;;  %v847_v15 = vld [vmem:[#allocation8 + $0x60] sm:$0xff] }
  0x5c   :  { %v2855_v14 = vpack.c.bf16 %v727_v11, %v726_v10  ;;  %v848_v16 = vld [vmem:[#allocation8 + $0x68] sm:$0xff]  ;;  %v850_v21 = vld [vmem:[#allocation8 + $0x78] sm:$0xff]  ;;  %v1116_v41 = vld [vmem:[#allocation8 + $0x90] sm:$0xff] }
  0x5d   :  { %2826 = vmatpush3.bf16.msra.mxu1 %v2823_v17  ;;  %2807 = vmatpush3.bf16.msra.mxu0 %v2806_v47  ;;  %v2859_v19 = vpack.c.bf16 %v848_v16, %v847_v15  ;;  %v1117_v42 = vld [vmem:[#allocation8 + $0x98] sm:$0xff]  ;;  %v1118_v43 = vld [vmem:[#allocation8 + $0xa0] sm:$0xff]  ;;  %v1119_v46 = vld [vmem:[#allocation8 + $0xa8] sm:$0xff] }
  0x5e   :  { %2828 = vmatprep.subr.bf16.mxu1 %v2827_v20  ;;  %2808 = vmatprep.subr.bf16.mxu0 %v3178_v44  ;;  %v2883_v45 = vpack.c.bf16 %v1117_v42, %v1116_v41  ;;  %v2887_v47 = vpack.c.bf16 %v1119_v46, %v1118_v43  ;;  %v1120_v48 = vld [vmem:[#allocation8 + $0xb0] sm:$0xff]  ;;  %v1121_v49 = vld [vmem:[#allocation8 + $0xb8] sm:$0xff]  ;;  %v1122_v51 = vld [vmem:[#allocation8 + $0xc0] sm:$0xff] }
  0x5f   :  { %v2891_v50 = vpack.c.bf16 %v1121_v49, %v1120_v48  ;;  %v2267_v54 = vld [vmem:[%s3468_s6 + $0x1] ss:$0 sm:$0xff]  ;;  %v979_v15 = vld [vmem:[#allocation7 + $0x98] sm:$0xff]  ;;  %v980_v16 = vld [vmem:[#allocation7 + $0xa0] sm:$0xff] }
  0x60   :  { %v1305_v46 = vld [vmem:[#allocation8 + $0x120] sm:$0xff]  ;;  %v1307_v48 = vld [vmem:[#allocation8 + $0x130] sm:$0xff]  ;;  %v1308_v49 = vld [vmem:[#allocation8 + $0x138] sm:$0xff] }
  0x61   :  { %2830 = vmatpush3.bf16.msra.mxu1 %v2827_v20  ;;  %2810 = vmatpush3.bf16.msra.mxu0 %v2809_v52  ;;  %v849_v20 = vld [vmem:[#allocation8 + $0x70] sm:$0xff]  ;;  %v1123_v52 = vld [vmem:[#allocation8 + $0xc8] sm:$0xff] }
  0x62   :  { %2832 = vmatprep.subr.bf16.mxu1 %v2831_v23  ;;  %2836 = vmatprep.subr.bf16.mxu0 %v2835_v53 }
  0x64   :  { %2508 = vmatmul.mubr.msk.f32.vlgmr.msra.gmra.mrb[0].mxu0 %vm265_vm5, %v258_v56 }
  0x65   :  { %2834 = vmatpush3.bf16.msra.mxu1 %v2831_v23  ;;  %2838 = vmatpush3.bf16.msra.mxu0 %v2835_v53  ;;  %v2895_v53 = vpack.c.bf16 %v1123_v52, %v1122_v51  ;;  %v2919_v51 = vpack.c.bf16 %v1308_v49, %v1307_v48  ;;  %v1309_v52 = vld [vmem:[#allocation8 + $0x140] sm:$0xff]  ;;  %v3183_v48 = vmov 4   ;;  %v3184_v49 = vmov 5  }
  0x66   :  { %2840 = vmatprep.subr.bf16.mxu0 %v2839_v57  ;;  %2884 = vmatprep.subr.bf16.mxu1 %v2883_v45 }
  0x68   :  { %2535 = vmatmul.mubr.msk.f32.vlgmr.msra.gmra.mrb[4].mxu1 %vm382_vm4, %v365_v24  ;;  %v2863_v24 = vpack.c.bf16 %v850_v21, %v849_v20  ;;  %v984_v20 = vld [vmem:[#allocation7 + $0xc0] sm:$0xff]  ;;  %v985_v21 = vld [vmem:[#allocation7 + $0xc8] sm:$0xff] }
  0x69   :  { %2537 = vmatprep.mubr.msk.f32.mxu1 %vm382_vm4, %v366_v25  ;;  %2842 = vmatpush3.bf16.msra.mxu0 %v2839_v57  ;;  %v851_v25 = vld [vmem:[#allocation8 + $0x80] sm:$0xff] }
  0x6a   :  { %2844 = vmatprep.subr.bf16.mxu0 %v2843_v60  ;;  %2886 = vmatpush3.bf16.msra.mxu1 %v2883_v45  ;;  %v1221_v45 = vld [vmem:[#allocation8 + $0x118] sm:$0xff] }
  0x6b   :  { %2888 = vmatprep.subr.bf16.mxu1 %v2887_v47 }
  0x6c   :  { %2538 = vmatmul.mubr.msk.f32.gmra.mrb[6].mxu1 %vm382_vm4, %v367_v26  ;;  %v852_v26 = vld [vmem:[#allocation8 + $0x88] sm:$0xff] }
  0x6d   :  { %2540 = vmatprep.mubr.msk.f32.mxu1 %vm382_vm4, %v368_v27  ;;  %2846 = vmatpush3.bf16.msra.mxu0 %v2843_v60 }
  0x6e   :  { %2848 = vmatprep.subr.bf16.mxu0 %v2847_v63  ;;  %2890 = vmatpush3.bf16.msra.mxu1 %v2887_v47  ;;  %v1306_v47 = vld [vmem:[#allocation8 + $0x128] sm:$0xff] }
  0x6f   :  { %2892 = vmatprep.subr.bf16.mxu1 %v2891_v50 }
  0x70   :  { %2541 = vmatmul.mubr.msk.f32.gmra.mrb[8].mxu1 %vm382_vm4, %v369_v28 }
  0x71   :  { %2543 = vmatprep.mubr.msk.f32.mxu1 %vm382_vm4, %v370_v29  ;;  %v2867_v29 = vpack.c.bf16 %v852_v26, %v851_v25  ;;  %v1215_v26 = vld [vmem:[#allocation8 + $0xe8] sm:$0xff] }
  0x72   :  { %2894 = vmatpush3.bf16.msra.mxu1 %v2891_v50  ;;  %v2915_v50 = vpack.c.bf16 %v1306_v47, %v1305_v46  ;;  %v3182_v46 = vmov 3  }
  0x73   :  { %2896 = vmatprep.subr.bf16.mxu1 %v2895_v53 }
  0x74   :  { %2544 = vmatmul.mubr.msk.f32.gmra.mrb[10].mxu1 %vm382_vm4, %v371_v30 }
  0x75   :  { %2546 = vmatprep.mubr.msk.f32.mxu1 %vm382_vm4, %v372_v31 }
  0x76   :  { %2898 = vmatpush3.bf16.msra.mxu1 %v2895_v53  ;;  %v1310_v53 = vld [vmem:[#allocation8 + $0x148] sm:$0xff] }
  0x78   :  { %2547 = vmatmul.mubr.msk.f32.gmra.mrb[12].mxu1 %vm382_vm4, %v373_v32 }
  0x79   :  { %2549 = vmatprep.mubr.msk.f32.mxu1 %vm382_vm4, %v374_v33 }
  0x7c   :  { %2550 = vmatmul.mubr.msk.f32.gmra.mrb[14].mxu1 %vm382_vm4, %v375_v34 }
  0x7d   :  { %2552 = vmatprep.mubr.msk.f32.mxu1 %vm382_vm4, %v376_v35 }
  0x80   :  { %2553 = vmatmul.mubr.msk.f32.gmra.mrb[16].mxu1 %vm382_vm4, %v377_v36 }
  0x81   :  { %2555 = vmatprep.mubr.msk.f32.mxu1 %vm382_vm4, %v378_v37 }
  0x84   :  { %2556 = vmatmul.mubr.msk.f32.gmra.mrb[18].mxu1 %vm382_vm4, %v379_v38 }
  0x85   :  { %2558 = vmatprep.mubr.msk.f32.mxu1 %vm382_vm4, %v380_v39 }
  0x88   :  { %2559 = vmatmul.mubr.msk.f32.gmra.mrb[20].mxu1 %vm382_vm4, %v381_v40  ;;  %v978_v40 = vld [vmem:[#allocation7 + $0x90] sm:$0xff] }
 0x11f   :  { %v3350_v1 = vpop.f32.mrb[0].mxu1 }
 0x120   :  { %v2489_v2 = vpop.f32.mrb[1].mxu1 }
 0x123   :  { %v3352_v3 = vpop.f32.mrb[2].mxu1 }
 0x124   :  { %v2494_v4 = vpop.f32.mrb[3].mxu1 }
 0x137   :  { %v3372_v38 = vpop.f32.mrb[0].mxu0 }
 0x138   :  { %v2509_v39 = vpop.f32.mrb[1].mxu0 }
 0x13b   :  { %v2536_v7 = vpop.f32.mrb[4].mxu1 }
 0x13c   :  { %v503_v8 = vpop.f32.mrb[5].mxu1 }
 0x13d   :  { %2573 = vmatprep.mubr.msk.f32.mxu0 %vm265_vm5, %v503_v8 }
 0x13e   :  { %2574 = vmatmul.mubr.msk.f32.vlgmr.msra.gmra.mrb[2].mxu0 %vm265_vm5, %v2536_v7 }
 0x13f   :  { %v2539_v12 = vpop.f32.mrb[6].mxu1  ;;  %2850 = vmatpush3.bf16.msra.mxu0 %v2847_v63 }
 0x140   :  { %v513_v13 = vpop.f32.mrb[7].mxu1  ;;  %2852 = vmatprep.subr.bf16.mxu0 %v2851_v9 }
 0x141   :  { %2576 = vmatprep.mubr.msk.f32.mxu0 %vm265_vm5, %v513_v13 }
 0x142   :  { %2577 = vmatmul.mubr.msk.f32.gmra.mrb[4].mxu0 %vm265_vm5, %v2539_v12 }
 0x143   :  { %v2542_v17 = vpop.f32.mrb[8].mxu1  ;;  %2854 = vmatpush3.bf16.msra.mxu0 %v2851_v9 }
 0x144   :  { %v523_v18 = vpop.f32.mrb[9].mxu1  ;;  %2856 = vmatprep.subr.bf16.mxu0 %v2855_v14 }
 0x145   :  { %2579 = vmatprep.mubr.msk.f32.mxu0 %vm265_vm5, %v523_v18  ;;  %v982_v18 = vld [vmem:[#allocation7 + $0xb0] sm:$0xff] }
 0x146   :  { %2580 = vmatmul.mubr.msk.f32.gmra.mrb[6].mxu0 %vm265_vm5, %v2542_v17  ;;  %v981_v17 = vld [vmem:[#allocation7 + $0xa8] sm:$0xff] }
 0x147   :  { %v2545_v22 = vpop.f32.mrb[10].mxu1  ;;  %2858 = vmatpush3.bf16.msra.mxu0 %v2855_v14 }
 0x148   :  { %v533_v23 = vpop.f32.mrb[11].mxu1  ;;  %2860 = vmatprep.subr.bf16.mxu0 %v2859_v19 }
 0x149   :  { %2594 = vmatprep.mubr.msk.f32.mxu0 %vm265_vm5, %v533_v23  ;;  %v1213_v23 = vld [vmem:[#allocation8 + $0xd8] sm:$0xff] }
 0x14a   :  { %2595 = vmatmul.mubr.msk.f32.vlgmr.msra.gmra.mrb[2].mxu0 %vm265_vm5, %v2545_v22  ;;  %v1124_v22 = vld [vmem:[#allocation8 + $0xd0] sm:$0xff] }
 0x14b   :  { %v2548_v27 = vpop.f32.mrb[12].mxu1  ;;  %2862 = vmatpush3.bf16.msra.mxu0 %v2859_v19  ;;  %v983_v19 = vld [vmem:[#allocation7 + $0xb8] sm:$0xff]  ;;  %2664 = vmatprep.subr.mxu1 %v1124_v22 }
 0x14c   :  { %v543_v28 = vpop.f32.mrb[13].mxu1  ;;  %2864 = vmatprep.subr.bf16.mxu0 %v2863_v24  ;;  %2665 = vmatpush3.msra.mxu1 %v1124_v22 }
 0x14d   :  { %2597 = vmatprep.mubr.msk.f32.mxu0 %vm265_vm5, %v543_v28 }
 0x14e   :  { %2598 = vmatmul.mubr.msk.f32.gmra.mrb[4].mxu0 %vm265_vm5, %v2548_v27  ;;  %v1216_v27 = vld [vmem:[#allocation8 + $0xf0] sm:$0xff] }
 0x14f   :  { %v2551_v30 = vpop.f32.mrb[14].mxu1  ;;  %2866 = vmatpush3.bf16.msra.mxu0 %v2863_v24  ;;  %v1214_v24 = vld [vmem:[#allocation8 + $0xe0] sm:$0xff] }
 0x150   :  { %v553_v31 = vpop.f32.mrb[15].mxu1  ;;  %2868 = vmatprep.subr.bf16.mxu0 %v2867_v29  ;;  %v2899_v25 = vpack.c.bf16 %v1214_v24, %v1213_v23  ;;  %v1492_v23 = vld [vmem:[#allocation7 + $0xd8] sm:$0xff]  ;;  %v1493_v24 = vld [vmem:[#allocation7 + $0xe0] sm:$0xff] }
 0x151   :  { %2600 = vmatprep.mubr.msk.f32.mxu0 %vm265_vm5, %v553_v31  ;;  %v1217_v31 = vld [vmem:[#allocation8 + $0xf8] sm:$0xff] }
 0x152   :  { %2601 = vmatmul.mubr.msk.f32.gmra.mrb[6].mxu0 %vm265_vm5, %v2551_v30  ;;  %2900 = vmatprep.subr.bf16.mxu1 %v2899_v25  ;;  %v2903_v30 = vpack.c.bf16 %v1216_v27, %v1215_v26  ;;  %v1596_v26 = vld [vmem:[#allocation8 + $0x1c0] sm:$0xff]  ;;  %v1685_v27 = vld [vmem:[#allocation8 + $0x1c8] sm:$0xff] }
 0x153   :  { %v2554_v32 = vpop.f32.mrb[16].mxu1  ;;  %2870 = vmatpush3.bf16.msra.mxu0 %v2867_v29 }
 0x154   :  { %v563_v33 = vpop.f32.mrb[17].mxu1 }
 0x155   :  { %2615 = vmatprep.mubr.msk.f32.mxu0 %vm265_vm5, %v563_v33 }
 0x156   :  { %2616 = vmatmul.mubr.msk.f32.vlgmr.msra.gmra.mrb[2].mxu0 %vm265_vm5, %v2554_v32  ;;  %v1218_v32 = vld [vmem:[#allocation8 + $0x100] sm:$0xff] }
 0x157   :  { %v2557_v34 = vpop.f32.mrb[18].mxu1 }
 0x158   :  { %v573_v35 = vpop.f32.mrb[19].mxu1 }
 0x159   :  { %2618 = vmatprep.mubr.msk.f32.mxu0 %vm265_vm5, %v573_v35 }
 0x15a   :  { %2619 = vmatmul.mubr.msk.f32.gmra.mrb[4].mxu0 %vm265_vm5, %v2557_v34  ;;  %v2907_v34 = vpack.c.bf16 %v1218_v32, %v1217_v31  ;;  %v1687_v32 = vld [vmem:[#allocation8 + $0x1d8] sm:$0xff] }
 0x15b   :  { %v2560_v36 = vpop.f32.mrb[20].mxu1 }
 0x15c   :  { %v583_v37 = vpop.f32.mrb[21].mxu1 }
 0x15d   :  { %2621 = vmatprep.mubr.msk.f32.mxu0 %vm265_vm5, %v583_v37  ;;  %v1220_v37 = vld [vmem:[#allocation8 + $0x110] sm:$0xff] }
 0x15e   :  { %2622 = vmatmul.mubr.msk.f32.gmra.mrb[6].mxu0 %vm265_vm5, %v2560_v36  ;;  %v1219_v36 = vld [vmem:[#allocation8 + $0x108] sm:$0xff] }
 0x15f   :  { %2636 = vmatprep.mubr.msk.f32.mxu0 %vm265_vm5, %v978_v40  ;;  %v2911_v40 = vpack.c.bf16 %v1220_v37, %v1219_v36  ;;  %v3180_v36 = vmov 0   ;;  %v2303_v37 = vld [vmem:[%s3468_s6 + $0x3] ss:$0 sm:$0xff] }
 0x160   :  { %3027 = vset.pattern.permute.xlu0 %v3180_v36 }
 0x229   :  { %v2617_v55 = vpop.f32.mrb[2].mxu0 }
 0x22a   :  { %v2980_v56 = vadd.f32 %v2617_v55, %v2267_v54  ;;  %v937_v57 = vpop.f32.mrb[3].mxu0  ;;  %v1311_v55 = vld [vmem:[#allocation8 + $0x150] sm:$0xff] }
 0x22b   :  { %v2981_v58 = vadd.f32 %v2267_v54, %v937_v57 }
 0x22c   :  { %v973_v59 = vmax.f32 %v2980_v56, 0.0  ;;  %v1312_v56 = vld [vmem:[#allocation8 + $0x158] sm:$0xff] }
 0x22d   :  { %v972_v60 = vmax.f32 %v2981_v58, 0.0  ;;  %v2620_v61 = vpop.f32.mrb[4].mxu0  ;;  %v2927_v57 = vpack.c.bf16 %v1312_v56, %v1311_v55  ;;  %v1313_v58 = vld [vmem:[#allocation8 + $0x160] sm:$0xff] }
 0x22e   :  { %v2982_v62 = vadd.f32 %v2620_v61, %v2267_v54  ;;  %v947_v63 = vpop.f32.mrb[5].mxu0  ;;  %v1399_v61 = vld [vmem:[#allocation8 + $0x178] sm:$0xff] }
 0x22f   :  { %v2871_v2 = vpack.c.bf16 %v973_v59, %v972_v60  ;;  %v2983_v4 = vadd.f32 %v2267_v54, %v947_v63  ;;  %v1397_v59 = vld [vmem:[#allocation8 + $0x168] sm:$0xff]  ;;  %v1398_v60 = vld [vmem:[#allocation8 + $0x170] sm:$0xff] }
 0x230   :  { %v975_v5 = vmax.f32 %v2982_v62, 0.0  ;;  %v1400_v62 = vld [vmem:[#allocation8 + $0x180] sm:$0xff]  ;;  %v2931_v63 = vpack.c.bf16 %v1398_v60, %v1397_v59  ;;  %v1788_v59 = vld [vmem:[#allocation8 + $0x1f8] sm:$0xff]  ;;  %v1774_v60 = vld [vmem:[#allocation8 + $0x1e8] sm:$0xff] }
 0x231   :  { %v974_v6 = vmax.f32 %v2983_v4, 0.0  ;;  %v2623_v7 = vpop.f32.mrb[6].mxu0  ;;  %2872 = vmatprep.subr.bf16.mxu0 %v2871_v2  ;;  %v1401_v4 = vld [vmem:[#allocation8 + $0x188] sm:$0xff] }
 0x232   :  { %v2984_v8 = vadd.f32 %v2623_v7, %v2267_v54  ;;  %v957_v9 = vpop.f32.mrb[7].mxu0  ;;  %2874 = vmatpush3.bf16.msra.mxu0 %v2871_v2  ;;  %v2935_v2 = vpack.c.bf16 %v1400_v62, %v1399_v61  ;;  %v1403_v7 = vld [vmem:[#allocation8 + $0x198] sm:$0xff]  ;;  %v1773_v61 = vld [vmem:[#allocation8 + $0x1e0] sm:$0xff]  ;;  %v1787_v62 = vld [vmem:[#allocation8 + $0x1f0] sm:$0xff] }
 0x233   :  { %v2875_v10 = vpack.c.bf16 %v975_v5, %v974_v6  ;;  %v2985_v11 = vadd.f32 %v2267_v54, %v957_v9  ;;  %v2923_v54 = vpack.c.bf16 %v1310_v53, %v1309_v52  ;;  %v1402_v5 = vld [vmem:[#allocation8 + $0x190] sm:$0xff] }
 0x234   :  { %v977_v12 = vmax.f32 %v2984_v8, 0.0  ;;  %v2939_v6 = vpack.c.bf16 %v1402_v5, %v1401_v4  ;;  %v1404_v8 = vld [vmem:[#allocation8 + $0x1a0] sm:$0xff] }
 0x235   :  { %v976_v13 = vmax.f32 %v2985_v11, 0.0  ;;  %2876 = vmatprep.subr.bf16.mxu0 %v2875_v10  ;;  %v2943_v9 = vpack.c.bf16 %v1404_v8, %v1403_v7  ;;  %v1491_v11 = vld [vmem:[#allocation7 + $0xd0] sm:$0xff] }
 0x236   :  { %2878 = vmatpush3.bf16.msra.mxu0 %v2875_v10  ;;  %v1405_v10 = vld [vmem:[#allocation8 + $0x1a8] sm:$0xff] }
 0x237   :  { %v2879_v14 = vpack.c.bf16 %v977_v12, %v976_v13  ;;  %v2290_v12 = vld [vmem:[%s3468_s6 + $0x2] ss:$0 sm:$0xff] }
 0x239   :  { %2880 = vmatprep.subr.bf16.mxu0 %v2879_v14 }
 0x23a   :  { %2882 = vmatpush3.bf16.msra.mxu0 %v2879_v14 }
 0x23d   :  { %2637 = vmatmul.mubr.msk.f32.vlgmr.msra.gmra.mrb[8].mxu0 %vm265_vm5, %v979_v15 }
 0x23e   :  { %2639 = vmatprep.mubr.msk.f32.mxu0 %vm265_vm5, %v980_v16 }
 0x241   :  { %2640 = vmatmul.mubr.msk.f32.gmra.mrb[10].mxu0 %vm265_vm5, %v981_v17 }
 0x242   :  { %2642 = vmatprep.mubr.msk.f32.mxu0 %vm265_vm5, %v982_v18  ;;  %v1594_v18 = vld [vmem:[#allocation8 + $0x1b0] sm:$0xff] }
 0x245   :  { %2643 = vmatmul.mubr.msk.f32.gmra.mrb[12].mxu0 %vm265_vm5, %v983_v19  ;;  %v1595_v19 = vld [vmem:[#allocation8 + $0x1b8] sm:$0xff] }
 0x246   :  { %2645 = vmatprep.mubr.msk.f32.mxu0 %vm265_vm5, %v984_v20  ;;  %v2951_v22 = vpack.c.bf16 %v1595_v19, %v1594_v18  ;;  %v1830_v19 = vld [vmem:[#allocation8 + $0x228] sm:$0xff] }
 0x249   :  { %2646 = vmatmul.mubr.msk.f32.gmra.mrb[14].mxu0 %vm265_vm5, %v985_v21 }
 0x24a   :  { %2736 = vmatprep.mubr.msk.f32.mxu0 %vm1495_vm7, %v1491_v11 }
 0x310   :  { %v2638_v28 = vpop.f32.mrb[8].mxu0 }
 0x311   :  { %v1076_v29 = vpop.f32.mrb[9].mxu0 }
 0x312   :  { %2666 = vmatprep.mubr.msk.f32.mxu1 %vm1125_vm6, %v1076_v29 }
 0x313   :  { %2667 = vmatmul.mubr.msk.f32.vlgmr.msra.gmra.mrb[22].mxu1 %vm1125_vm6, %v2638_v28  ;;  %v1686_v28 = vld [vmem:[#allocation8 + $0x1d0] sm:$0xff] }
 0x314   :  { %2902 = vmatpush3.bf16.msra.mxu1 %v2899_v25  ;;  %v2641_v33 = vpop.f32.mrb[10].mxu0  ;;  %v1494_v25 = vld [vmem:[#allocation7 + $0xe8] sm:$0xff]  ;;  %v2955_v29 = vpack.c.bf16 %v1686_v28, %v1685_v27  ;;  %v1843_v27 = vld [vmem:[#allocation8 + $0x230] sm:$0xff] }
 0x315   :  { %2904 = vmatprep.subr.bf16.mxu1 %v2903_v30  ;;  %v1086_v35 = vpop.f32.mrb[11].mxu0 }
 0x316   :  { %2687 = vmatprep.mubr.msk.f32.mxu1 %vm1125_vm6, %v1086_v35  ;;  %v3179_v35 = vmov 1  }
 0x317   :  { %3028 = vset.pattern.permute.xlu1 %v3179_v35 }
 0x318   :  { %2906 = vmatpush3.bf16.msra.mxu1 %v2903_v30  ;;  %v2644_v39 = vpop.f32.mrb[12].mxu0 }
 0x319   :  { %2908 = vmatprep.subr.bf16.mxu1 %v2907_v34  ;;  %v1096_v41 = vpop.f32.mrb[13].mxu0 }
 0x31c   :  { %2910 = vmatpush3.bf16.msra.mxu1 %v2907_v34  ;;  %v2647_v42 = vpop.f32.mrb[14].mxu0 }
 0x31d   :  { %2912 = vmatprep.subr.bf16.mxu1 %v2911_v40  ;;  %v1106_v43 = vpop.f32.mrb[15].mxu0 }
 0x320   :  { %2914 = vmatpush3.bf16.msra.mxu1 %v2911_v40 }
 0x321   :  { %2685 = vmatprep.subr.mxu1 %v1221_v45 }
 0x324   :  { %2686 = vmatpush3.msra.mxu1 %v1221_v45  ;;  %v3181_v45 = vmov 2  }
 0x325   :  { %2688 = vmatmul.mubr.msk.f32.vlgmr.msra.gmra.mrb[22].mxu1 %vm1125_vm6, %v2641_v33  ;;  %2916 = vmatprep.subr.bf16.mxu1 %v2915_v50 }
 0x326   :  { %2918 = vmatpush3.bf16.msra.mxu1 %v2915_v50  ;;  %2708 = vmatprep.mubr.msk.f32.mxu1 %vm1125_vm6, %v1096_v41  ;;  %v3185_v50 = vmov 6  }
 0x327   :  { %2920 = vmatprep.subr.bf16.mxu1 %v2919_v51 }
 0x32a   :  { %2922 = vmatpush3.bf16.msra.mxu1 %v2919_v51  ;;  %v88_v51 = vld [vmem:[%s3462_s0] sm:$0x3] }
 0x32b   :  { %2924 = vmatprep.subr.bf16.mxu1 %v2923_v54 }
 0x32e   :  { %2926 = vmatpush3.bf16.msra.mxu1 %v2923_v54 }
 0x32f   :  { %2928 = vmatprep.subr.bf16.mxu1 %v2927_v57 }
 0x332   :  { %2930 = vmatpush3.bf16.msra.mxu1 %v2927_v57 }
 0x333   :  { %2706 = vmatprep.subr.mxu1 %v1313_v58 }
 0x336   :  { %2707 = vmatpush3.msra.mxu1 %v1313_v58 }
 0x337   :  { %2709 = vmatmul.mubr.msk.f32.vlgmr.msra.gmra.mrb[22].mxu1 %vm1125_vm6, %v2644_v39  ;;  %2932 = vmatprep.subr.bf16.mxu1 %v2931_v63 }
 0x338   :  { %2934 = vmatpush3.bf16.msra.mxu1 %v2931_v63  ;;  %2729 = vmatprep.mubr.msk.f32.mxu1 %vm1125_vm6, %v1106_v43  ;;  %v1802_v63 = vld [vmem:[#allocation8 + $0x208] sm:$0xff] }
 0x339   :  { %2936 = vmatprep.subr.bf16.mxu1 %v2935_v2 }
 0x33c   :  { %2938 = vmatpush3.bf16.msra.mxu1 %v2935_v2 }
 0x33d   :  { %2940 = vmatprep.subr.bf16.mxu1 %v2939_v6 }
 0x340   :  { %2942 = vmatpush3.bf16.msra.mxu1 %v2939_v6 }
 0x341   :  { %2944 = vmatprep.subr.bf16.mxu1 %v2943_v9 }
 0x344   :  { %2946 = vmatpush3.bf16.msra.mxu1 %v2943_v9 }
 0x345   :  { %2727 = vmatprep.subr.mxu1 %v1405_v10 }
 0x348   :  { %2728 = vmatpush3.msra.mxu1 %v1405_v10  ;;  %v1801_v10 = vld [vmem:[#allocation8 + $0x200] sm:$0xff] }
 0x349   :  { %2730 = vmatmul.mubr.msk.f32.vlgmr.msra.gmra.mrb[22].mxu1 %vm1125_vm6, %v2647_v42 }
 0x41c   :  { %v2731_v13 = vpop.f32.mrb[22].mxu1 }
 0x41d   :  { %v2986_v14 = vadd.f32 %v2731_v13, %v2290_v12  ;;  %v1478_v15 = vpop.f32.mrb[23].mxu1  ;;  %v1815_v13 = vld [vmem:[#allocation8 + $0x210] sm:$0xff] }
 0x41e   :  { %v2987_v16 = vadd.f32 %v2290_v12, %v1478_v15 }
 0x41f   :  { %v1490_v17 = vmax.f32 %v2986_v14, 0.0  ;;  %v1816_v14 = vld [vmem:[#allocation8 + $0x218] sm:$0xff] }
 0x420   :  { %v1489_v20 = vmax.f32 %v2987_v16, 0.0 }
 0x422   :  { %v2947_v21 = vpack.c.bf16 %v1490_v17, %v1489_v20 }
 0x424   :  { %2948 = vmatprep.subr.bf16.mxu0 %v2947_v21 }
 0x425   :  { %2950 = vmatpush3.bf16.msra.mxu0 %v2947_v21 }
 0x426   :  { %2952 = vmatprep.subr.bf16.mxu0 %v2951_v22 }
 0x428   :  { %2737 = vmatmul.mubr.msk.f32.vlgmr.msra.gmra.mrb[16].mxu0 %vm1495_vm7, %v1492_v23  ;;  %v1829_v23 = vld [vmem:[#allocation8 + $0x220] sm:$0xff] }
 0x429   :  { %2739 = vmatprep.mubr.msk.f32.mxu0 %vm1495_vm7, %v1493_v24  ;;  %2954 = vmatpush3.bf16.msra.mxu0 %v2951_v22  ;;  %v1844_v24 = vld [vmem:[#allocation8 + $0x238] sm:$0xff] }
 0x42a   :  { %2746 = vmatprep.subr.mxu0 %v1596_v26 }
 0x42c   :  { %2740 = vmatmul.mubr.msk.f32.gmra.mrb[18].mxu0 %vm1495_vm7, %v1494_v25 }
 0x42d   :  { %2747 = vmatpush3.msra.mxu0 %v1596_v26 }
 0x42e   :  { %2956 = vmatprep.subr.bf16.mxu0 %v2955_v29 }
 0x4fb   :  { %v2738_v30 = vpop.f32.mrb[16].mxu0 }
 0x4fc   :  { %v1574_v31 = vpop.f32.mrb[17].mxu0 }
 0x4fd   :  { %2748 = vmatprep.mubr.msk.f32.mxu0 %vm1597_vm8, %v1574_v31 }
 0x4fe   :  { %2749 = vmatmul.mubr.msk.f32.vlgmr.msra.gmra.mrb[20].mxu0 %vm1597_vm8, %v2738_v30  ;;  %v1858_v30 = vld [vmem:[#allocation8 + $0x248] sm:$0xff] }
 0x4ff   :  { %2958 = vmatpush3.bf16.msra.mxu0 %v2955_v29  ;;  %v2741_v33 = vpop.f32.mrb[18].mxu0 }
 0x500   :  { %v1584_v34 = vpop.f32.mrb[19].mxu0  ;;  %2755 = vmatprep.subr.mxu0 %v1687_v32 }
 0x501   :  { %2757 = vmatprep.mubr.msk.f32.mxu0 %vm1597_vm8, %v1584_v34 }
 0x503   :  { %2756 = vmatpush3.msra.mxu0 %v1687_v32 }
 0x504   :  { %2959 = vmatprep.subr.bf16.mxu0 %v3178_v44 }
 0x506   :  { %2758 = vmatmul.mubr.msk.f32.vlgmr.msra.gmra.mrb[20].mxu0 %vm1597_vm8, %v2741_v33 }
 0x507   :  { %2764 = vmatprep.mubr.msk.f32.mxu0 %vm3177_vm0, %v3176_v0 }
 0x5d9   :  { %v2759_v39 = vpop.f32.mrb[20].mxu0 }
 0x5da   :  { %v2988_v40 = vadd.f32 %v2759_v39, %v2303_v37  ;;  %v1760_v41 = vpop.f32.mrb[21].mxu0 }
 0x5db   :  { %v2989_v43 = vadd.f32 %v2303_v37, %v1760_v41 }
 0x5dc   :  { %v1772_v42 = vmax.f32 %v2988_v40, 0.0 }
 0x5dd   :  { %v1771_v47 = vmax.f32 %v2989_v43, 0.0 }
 0x5de   :  { %1794 = vperm.xlu1 %3028, %v1772_v42   ;;  %1782 = vperm.xlu0 %3027, %v1772_v42  }
 0x5e2   :  { %3029 = vset.pattern.permute.xlu1 %v3181_v45  ;;  %3030 = vset.pattern.permute.xlu0 %v3182_v46 }
 0x5e3   :  { %1808 = vperm.xlu1 %3029, %v1772_v42   ;;  %1822 = vperm.xlu0 %3030, %v1772_v42  }
 0x5e7   :  { %3031 = vset.pattern.permute.xlu1 %v3183_v48  ;;  %3033 = vset.pattern.permute.xlu0 %v3180_v36 }
 0x5e8   :  { %1836 = vperm.xlu1 %3031, %v1772_v42   ;;  %1777 = vperm.xlu0 %3033, %v1771_v47  }
 0x5ec   :  { %3032 = vset.pattern.permute.xlu1 %v3184_v49  ;;  %3035 = vset.pattern.permute.xlu0 %v3181_v45 }
 0x5ed   :  { %1850 = vperm.xlu1 %3032, %v1772_v42   ;;  %1804 = vperm.xlu0 %3035, %v1771_v47  }
 0x5f1   :  { %3034 = vset.pattern.permute.xlu1 %v3179_v35  ;;  %3038 = vset.pattern.permute.xlu0 %v3184_v49 }
 0x5f2   :  { %1790 = vperm.xlu1 %3034, %v1771_v47   ;;  %1846 = vperm.xlu0 %3038, %v1771_v47  }
 0x5f6   :  { %3036 = vset.pattern.permute.xlu1 %v3182_v46  ;;  %3040 = vset.pattern.permute.xlu0 %v3185_v50 }
 0x5f7   :  { %1818 = vperm.xlu1 %3036, %v1771_v47   ;;  %1864 = vperm.xlu0 %3040, %v1772_v42  }
 0x5fb   :  { %3037 = vset.pattern.permute.xlu1 %v3183_v48 }
 0x5fc   :  { %1832 = vperm.xlu1 %3037, %v1771_v47  }
 0x600   :  { %3039 = vset.pattern.permute.xlu1 %v3185_v50 }
 0x601   :  { %1860 = vperm.xlu1 %3039, %v1771_v47   ;;  %v2236_v47 = vld [vmem:[#allocation5] ss:$0 sm:$0xff] }
 0x605   :  { %3041 = vset.pattern.permute.xlu1 %v3180_v36  ;;  %v1857_v36 = vld [vmem:[#allocation8 + $0x240] sm:$0xff] }
 0x606   :  { %92 = vperm.xlu1 %3041, %v88_v51   ;;  %v1871_v51 = vld [vmem:[%s3468_s6 + $0x8] sm:$0x3] }
 0x65d   :  { %v1795_v52 = vpop.permute.xlu1 %1794  ;;  %v1783_v53 = vpop.permute.xlu0 %1782 }
 0x65e   :  { %v1798_v4 = vmul.f32 %v1795_v52, %v1788_v59  ;;  %v1786_v5 = vmul.f32 %v1783_v53, %v1774_v60 }
 0x660   :  { %v1800_v12 = vadd.f32 %v1798_v4, %v1786_v5  ;;  %v1956_v5 = vld [vmem:[#allocation5 + $0x48] sm:$0xff] }
 0x662   :  { %v1809_v54 = vpop.permute.xlu1 %1808  ;;  %v1823_v55 = vpop.permute.xlu0 %1822 }
 0x663   :  { %v1812_v9 = vmul.f32 %v1809_v54, %v1802_v63  ;;  %v1826_v22 = vmul.f32 %v1823_v55, %v1816_v14  ;;  %v1960_v55 = vld [vmem:[#allocation5 + $0x68] sm:$0xff] }
 0x665   :  { %v1814_v18 = vadd.f32 %v1812_v9, %v1800_v12 }
 0x667   :  { %v1837_v56 = vpop.permute.xlu1 %1836  ;;  %v1778_v57 = vpop.permute.xlu0 %1777  ;;  %v1828_v25 = vadd.f32 %v1826_v22, %v1814_v18  ;;  %v2123_v18 = vld [vmem:[#allocation5 + $0x88] sm:$0xff] }
 0x668   :  { %v1785_v7 = vmul.f32 %v1778_v57, %v1773_v61  ;;  %v1840_v26 = vmul.f32 %v1837_v56, %v1830_v19  ;;  %v1961_v56 = vld [vmem:[#allocation5 + $0x70] sm:$0xff] }
 0x669   :  { %v2963_v57 = vpack.c.bf16 %v1961_v56, %v1960_v55  ;;  %v2124_v19 = vld [vmem:[#allocation5 + $0x90] sm:$0xff] }
 0x66a   :  { %v1842_v37 = vadd.f32 %v1840_v26, %v1828_v25 }
 0x66c   :  { %v1851_v58 = vpop.permute.xlu1 %1850  ;;  %v1805_v2 = vpop.permute.xlu0 %1804 }
 0x66d   :  { %v1811_v15 = vmul.f32 %v1805_v2, %v1801_v10  ;;  %v1854_v33 = vmul.f32 %v1851_v58, %v1844_v24  ;;  %v1962_v58 = vld [vmem:[#allocation5 + $0x78] sm:$0xff]  ;;  %v2127_v24 = vld [vmem:[#allocation5 + $0xa8] sm:$0xff] }
 0x66e   :  { %v1958_v10 = vld [vmem:[#allocation5 + $0x58] sm:$0xff] }
 0x66f   :  { %v1856_v42 = vadd.f32 %v1854_v33, %v1842_v37 }
 0x671   :  { %v1791_v6 = vpop.permute.xlu1 %1790  ;;  %v1847_v16 = vpop.permute.xlu0 %1846 }
 0x672   :  { %v1797_v8 = vmul.f32 %v1791_v6, %v1787_v62  ;;  %v1853_v34 = vmul.f32 %v1847_v16, %v1843_v27  ;;  %v1957_v6 = vld [vmem:[#allocation5 + $0x50] sm:$0xff] }
 0x673   :  { %v2966_v9 = vpack.c.bf16 %v1957_v6, %v1956_v5 }
 0x674   :  { %v1799_v11 = vadd.f32 %v1797_v8, %v1785_v7 }
 0x676   :  { %v1819_v17 = vpop.permute.xlu1 %1818  ;;  %v1813_v20 = vadd.f32 %v1811_v15, %v1799_v11  ;;  %v1865_v31 = vpop.permute.xlu0 %1864  ;;  %v1959_v11 = vld [vmem:[#allocation5 + $0x60] sm:$0xff] }
 0x677   :  { %v1825_v21 = vmul.f32 %v1819_v17, %v1815_v13  ;;  %v1868_v39 = vmul.f32 %v1865_v31, %v1858_v30  ;;  %v2969_v14 = vpack.c.bf16 %v1959_v11, %v1958_v10  ;;  %v2122_v17 = vld [vmem:[#allocation5 + $0x80] sm:$0xff] }
 0x679   :  { %v1827_v29 = vadd.f32 %v1825_v21, %v1813_v20  ;;  %v1870_v45 = vadd.f32 %v1868_v39, %v1856_v42  ;;  %v2972_v20 = vpack.c.bf16 %v2123_v18, %v2122_v17  ;;  %v2125_v21 = vld [vmem:[#allocation5 + $0x98] sm:$0xff] }
 0x67a   :  { %v2975_v22 = vpack.c.bf16 %v2125_v21, %v2124_v19 }
 0x67b   :  { %v1833_v28 = vpop.permute.xlu1 %1832 }
 0x67c   :  { %v1839_v32 = vmul.f32 %v1833_v28, %v1829_v23  ;;  %v2126_v23 = vld [vmem:[#allocation5 + $0xa0] sm:$0xff] }
 0x67d   :  { %v2978_v25 = vpack.c.bf16 %v2127_v24, %v2126_v23 }
 0x67e   :  { %v1841_v35 = vadd.f32 %v1839_v32, %v1827_v29 }
 0x680   :  { %v1861_v40 = vpop.permute.xlu1 %1860  ;;  %v1855_v41 = vadd.f32 %v1853_v34, %v1841_v35 }
 0x681   :  { %v1867_v43 = vmul.f32 %v1861_v40, %v1857_v36 }
 0x683   :  { %v1869_v46 = vadd.f32 %v1867_v43, %v1855_v41 }
 0x685   :  { %v2960_v48 = vpack.c.bf16 %v1870_v45, %v1869_v46  ;;  %v93_v49 = vpop.permute.xlu1 %92 }
 0x686   :  { %v99_v50 = vmul.f32 %v2236_v47, %v93_v49 }
 0x687   :  { %2961 = vmatpush3.bf16.msra.mxu0 %v2960_v48 }
 0x688   :  { %v180_v52 = vadd.f32 %v3350_v1, %v99_v50  ;;  %2962 = vmatprep.subr.bf16.mxu0 %v3178_v44  ;;  %v2241_v1 = vld [vmem:[%s3468_s6] ss:$0 sm:$0xff] }
 0x68a   :  { %v257_v53 = vadd.f32 %v3352_v3, %v180_v52  ;;  %2765 = vmatmul.mubr.msk.f32.vlgmr.msra.gmra.mrb[22].mxu0 %vm1495_vm7, %v1871_v51  ;;  %v2306_v3 = vld [vmem:[%s3468_s6 + $0x4] ss:$0 sm:$0xff] }
 0x68b   :  { %2773 = vmatprep.mubr.msk.f32.mxu0 %vm3177_vm0, %v3176_v0  ;;  %2964 = vmatpush3.bf16.msra.mxu0 %v2963_v57 }
 0x68c   :  { %v339_v54 = vadd.f32 %v3372_v38, %v257_v53  ;;  %2771 = vmatprep.subr.mxu0 %v3176_v0 }
 0x68e   :  { %v345_v59 = vadd.f32 %v2241_v1, %v339_v54 }
 0x68f   :  { %2772 = vmatpush3.msra.mxu0 %v1962_v58 }
 0x690   :  { %2965 = vmatprep.subr.bf16.mxu0 %v3178_v44  ;;  %v347_v62 = vmin.f32 %v345_v59, 0.0  ;;  %vm346_vm11 = vcmp.gt.f32.partialorder %v345_v59, 0.0 }
 0x692   :  { %v348_v4 = vmul.f32 1.442695, %v347_v62 }
 0x75d   :  { %v1946_v38 = vpop.f32.mrb[22].mxu0 }
 0x75e   :  { %v1947_v60 = vadd.f32 %v2306_v3, %v1946_v38  ;;  %v2766_v61 = vpop.f32.mrb[23].mxu0 }
 0x760   :  { %v1951_v63 = vmin.f32 %v1947_v60, 0.0  ;;  %vm1950_vm9 = vcmp.gt.f32.partialorder %v1947_v60, 0.0 }
 0x762   :  { %v1952_v2 = vmul.f32 1.442695, %v1951_v63 }
 0x764   :  { %3042 = vpow2.f32 %v1952_v2 }
 0x765   :  { %3044 = vpow2.f32 %v348_v4 }
 0x76e   :  { %v3043_v7 = vpop.eup %3042 }
 0x76f   :  { %v2308_v8 = vadd.f32 -1.0, %v3043_v7  ;;  %v3045_v13 = vpop.eup %3044 }
 0x770   :  { %v2242_v15 = vadd.f32 -1.0, %v3045_v13 }
 0x771   :  { %v1955_v12 = vsel %vm1950_vm9, %v1947_v60, %v2308_v8 }
 0x772   :  { %2774 = vmatmul.mubr.msk.f32.vlgmr.msra.gmra.mrb[24].mxu0 %vm1597_vm8, %v1955_v12  ;;  %v351_v16 = vsel %vm346_vm11, %v345_v59, %v2242_v15 }
 0x773   :  { %2967 = vmatpush3.bf16.msra.mxu0 %v2966_v9  ;;  %2784 = vmatprep.mubr.msk.f32.mxu0 %vm3177_vm0, %v3176_v0 }
 0x774   :  { %2968 = vmatprep.subr.bf16.mxu0 %v3178_v44 }
 0x777   :  { %2970 = vmatpush3.bf16.msra.mxu0 %v2969_v14 }
 0x778   :  { %2971 = vmatprep.subr.bf16.mxu0 %v3178_v44 }
 0x77a   :  { %2785 = vmatmul.mubr.msk.f32.vlgmr.msra.gmra.mrb[26].mxu0 %vm2036_vm10, %v351_v16 }
 0x77b   :  { %2799 = vmatprep.mubr.msk.f32.mxu0 %vm3177_vm0, %v3176_v0  ;;  %2973 = vmatpush3.bf16.msra.mxu0 %v2972_v20  ;;  %v2311_v0 = vld [vmem:[%s3468_s6 + $0x5] ss:$0 sm:$0xff] }
 0x77c   :  { %2974 = vmatprep.subr.bf16.mxu0 %v3178_v44 }
 0x77f   :  { %2976 = vmatpush3.bf16.msra.mxu0 %v2975_v22 }
 0x780   :  { %2977 = vmatprep.subr.bf16.mxu0 %v3178_v44  ;;  %v2313_v44 = vld [vmem:[%s3468_s6 + $0x6] ss:$0 sm:$0xff]  ;;  %s3140_s6 = scalar_lea.vmem %s2226_s10, 32 }
 0x781   :  { %p3141_p4 = scmp.ne.s32.totalorder %s2226_s10, %s3140_s6  ;;  %p3146_p6 = scmp.lt.s32.totalorder %s3140_s6, %s3140_s6 }
 0x783   :  { %2979 = vmatpush3.bf16.msra.mxu0 %v2978_v25  ;;  %p3147_p7 = por %p3146_p6, %p3145_p5 }
 0x785   :  { %p3148_p8 = pnand %p3147_p7, %p3141_p4 }
 0x845   :  { %v2032_v26 = vpop.f32.mrb[24].mxu0 }
 0x846   :  { %v2775_v27 = vpop.f32.mrb[25].mxu0 }
 0x84d   :  { %v2106_v28 = vpop.f32.mrb[26].mxu0 }
 0x84e   :  { %v2107_v29 = vadd.f32 %v2106_v28, %v2032_v26  ;;  %v2786_v30 = vpop.f32.mrb[27].mxu0 }
 0x850   :  { %v2115_v31 = vadd.f32 %v2311_v0, %v2107_v29 }
 0x852   :  { %v2117_v32 = vmin.f32 %v2115_v31, 0.0  ;;  %vm2116_vm12 = vcmp.gt.f32.partialorder %v2115_v31, 0.0 }
 0x854   :  { %v2118_v33 = vmul.f32 1.442695, %v2117_v32 }
 0x856   :  { %3046 = vpow2.f32 %v2118_v33 }
 0x860   :  { %v3047_v34 = vpop.eup %3046 }
 0x861   :  { %v2312_v35 = vadd.f32 -1.0, %v3047_v34 }
 0x863   :  { %v2121_v36 = vsel %vm2116_vm12, %v2115_v31, %v2312_v35 }
 0x864   :  { %2800 = vmatmul.mubr.msk.f32.vlgmr.msra.gmra.mrb[28].mxu0 %vm265_vm5, %v2121_v36 }
 0x937   :  { %v2202_v37 = vpop.f32.mrb[28].mxu0 }
 0x938   :  { %v2203_v39 = vadd.f32 %v2313_v44, %v2202_v37  ;;  %v2801_v40 = vpop.f32.mrb[29].mxu0 }
 0x93a   :  { %v2207_v41 = vsel %vm2206_vm13, %v2203_v39, -inf }
 0x93b   :  { %2208 = vmax.xlane.f32.xlu1 %v2207_v41 }
 0x9c8   :  { %v2209_v42 = vpop.xlane.xlu1 %2208 }
 0x9c9   :  { %v2210_v43 = vsub.f32 %v2203_v39, %v2209_v42 }
 0x9cb   :  { %v2211_v45 = vmul.f32 1.442695, %v2210_v43 }
 0x9cd   :  { %3048 = vpow2.f32 %v2211_v45 }
 0x9d7   :  { %v3049_v46 = vpop.eup %3048 }
 0x9d8   :  { %v2213_v47 = vsel %vm2206_vm13, %v3049_v46, 0.0 }
 0x9d9   :  { %2214 = vadd.xlane.f32.xlu0 %v2213_v47 }
 0xa66   :  { %v2215_v48 = vpop.xlane.xlu0 %2214 }
 0xa67   :  { %3050 = vrcp.f32 %v2215_v48 }
 0xa71   :  { %v3051_v49 = vpop.eup %3050 }
 0xa72   :  { %v2217_v50 = vmul.f32 %v3051_v49, %v3049_v46 }
 0xa74   :  { %2218 = vst.msk [vmem:[#allocation10] sm:$0x3] %vm2206_vm13, %v2217_v50 }
 0xa75   :  { %3151 = shalt.err (!%p3148_p8)
}
 0xa76   :  { %s3152_s15 = scalar_lea.hbm %s3471_s9, 32 }
 0xa77   :  { %p3153_p9 = scmp.ne.s32.totalorder %s3471_s9, %s3152_s15  ;;  %p3156_p10 = scmp.lt.u32.totalorder %s3152_s15, %s3471_s9 }
 0xa79   :  { %p3158_p11 = pnand %p3156_p10, %p3153_p9 }
 0xa7b   :  { %3161 = shalt.err (!%p3158_p11)
}
 0xa7c   :  { %2228 = dma.vmem_to_hbm [thread:$0]  %s2226_s10, 32, %s3471_s9, [#allocation4]  }
 0xa7d   :  { %3168 = dma.done.wait [#allocation4], 32  }
 0xa7e   :  { %3169 = vsyncadd [#allocation4], 4294967264 }
 0xa7f   :  { %2232 = vsyncpa [#allocation3], 1 }
 0xa80   :  { %2233 = vsyncpa [#allocation6], 1 }
 0xa81   :  { %2234 = vsyncpa [#allocation9], 1 }
 0xa82   :  { %2235 = vsyncpa [#allocation4], 1 }

</bundles_post_ra>
